<compile_context>
chip_gen: v5e
topology: v5e:2x2
jax: 0.10.0
libtpu: 0.0.40
codegen_flags: <defaults>
</compile_context>

<pallas_src>
import functools
import math

import jax
import jax.numpy as jnp
from jax import lax
from jax.experimental import pallas as pl
from jax.experimental.pallas import tpu as pltpu


# -----------------------------------------------------------------------------
# Fused kernel: DynamicSparseAttention + distill/gate/out + multi-scale
# attention-pooling weighted sums.  grid = (B,); one program per batch element.
# -----------------------------------------------------------------------------
def _msap_fused_kernel(x_ref, wqkv_ref, bqkv_ref, wd_ref, bd_ref,
                       wg1_ref, bg1_ref, wgp_ref, bgp_ref, wo_ref, bo_ref,
                       wq_pool_ref, bq_pool_ref, out_ref, *,
                       num_heads, m_lo, frac):
    S = x_ref.shape[1]
    D = x_ref.shape[2]
    hd = D // num_heads
    cd = wqkv_ref.dtype                       # MXU operand dtype (f32 or bf16)
    neg_inf = jnp.float32(-jnp.inf)
    track_hi = (frac != 0.0)                  # static: skip the upper order
                                              # statistic at integral positions

    x = x_ref[0]                                                   # (S, D) f32

    # ---- stacked QKV projection: one lane-dense MXU matmul (Q pre-scaled) ----
    qkv = jnp.dot(x.astype(cd), wqkv_ref[...],
                  preferred_element_type=jnp.float32) + bqkv_ref[...]  # (S, 3D)
    q = qkv[:, 0 * D:1 * D]
    k = qkv[:, 1 * D:2 * D]
    v = qkv[:, 2 * D:3 * D]

    # ---- exact order statistics -----------------------------------------
    def _float_to_key(s):
        # monotone f32 -> int32 sort key (order-preserving, tie-exact)
        b = pltpu.bitcast(s, jnp.int32)
        return jnp.where(b >= 0, b, b ^ jnp.int32(0x7FFFFFFF))

    def _key_to_float(kk):
        b = jnp.where(kk >= 0, kk, kk ^ jnp.int32(0x7FFFFFFF))
        return pltpu.bitcast(b, jnp.float32)

    def _kth_largest(scores, m):
        """Exact per-row m-th largest via 32-step bisection on int32 keys."""
        keys = _float_to_key(scores)                               # (S, S)
        lo0 = jnp.full((S, 1), jnp.iinfo(jnp.int32).min, jnp.int32)
        hi0 = jnp.full((S, 1), jnp.iinfo(jnp.int32).max, jnp.int32)
        one = jnp.ones((S, 1), jnp.int32)
        m_f = jnp.float32(m)

        def body(_, carry):
            lo, hi = carry
            # overflow-safe floor((lo + hi) / 2)
            mid = (lax.shift_right_arithmetic(lo, one) +
                   lax.shift_right_arithmetic(hi, one) + (lo & hi & one))
            cnt = jnp.sum((keys >= mid).astype(jnp.float32),
                          axis=-1, keepdims=True)
            ge = cnt >= m_f
            return jnp.where(ge, mid, lo), jnp.where(ge, hi, mid)

        lo, _ = lax.fori_loop(0, 32, body, (lo0, hi0))
        return _key_to_float(lo)                                   # (S, 1)

    # ---- torch.quantile(scores, q, dim=-1, keepdim=True), 'linear' interp ----
    def _quantile_threshold(scores):
        if m_lo <= 8:
            # exact top-m group removal, statically unrolled (O(m) passes)
            def body(carry):
                if track_hi:
                    work, removed, vlo, vhi = carry
                else:
                    work, removed, vlo = carry
                mval = jnp.max(work, axis=-1, keepdims=True)           # (S, 1)
                cnt = jnp.sum((work == mval).astype(jnp.float32),
                              axis=-1, keepdims=True)                  # (S, 1)
                new_removed = removed + cnt
                vlo = jnp.where((removed < m_lo) & (new_removed >= m_lo),
                                mval, vlo)
                if track_hi:
                    vhi = jnp.where((removed < m_lo - 1)
                                    & (new_removed >= m_lo - 1), mval, vhi)
                work = jnp.where(work == mval, neg_inf, work)
                if track_hi:
                    return work, new_removed, vlo, vhi
                return work, new_removed, vlo

            zeros = jnp.zeros((S, 1), jnp.float32)
            ninf = jnp.full((S, 1), neg_inf, jnp.float32)
            carry = (scores, zeros, ninf, ninf) if track_hi else \
                    (scores, zeros, ninf)
            for _ in range(int(m_lo)):
                carry = body(carry)
            v_lo = carry[2]
            if track_hi:
                v_hi = carry[3]
                return v_lo + jnp.float32(frac) * (v_hi - v_lo)        # (S, 1)
            return v_lo

        # bisection / counting search: pass count independent of sparsity & S
        v_lo = _kth_largest(scores, m_lo)
        if not track_hi:
            return v_lo
        gt = scores > v_lo
        c_gt = jnp.sum(gt.astype(jnp.float32), axis=-1, keepdims=True)
        v_next = jnp.min(jnp.where(gt, scores, jnp.float32(jnp.inf)),
                         axis=-1, keepdims=True)
        v_hi = jnp.where(c_gt >= jnp.float32(m_lo - 1), v_next, v_lo)
        return v_lo + jnp.float32(frac) * (v_hi - v_lo)

    # ---- per-head sparse attention (heads kept VMEM-resident) ----
    head_outs = []
    for h in range(num_heads):
        qh = q[:, h * hd:(h + 1) * hd].astype(cd)
        kh = k[:, h * hd:(h + 1) * hd].astype(cd)
        vh = v[:, h * hd:(h + 1) * hd].astype(cd)
        scores = lax.dot_general(qh, kh, (((1,), (1,)), ((), ())),
                                 preferred_element_type=jnp.float32)   # (S, S)

        thr = _quantile_threshold(scores)                              # (S, 1)
        masked = jnp.where(scores >= thr, scores, neg_inf)
        mrow = jnp.max(masked, axis=-1, keepdims=True)
        p = jnp.exp(masked - mrow)
        p = p * pl.reciprocal(jnp.sum(p, axis=-1, keepdims=True), approx=True)
        head_outs.append(jnp.dot(p.astype(cd), vh,
                                 preferred_element_type=jnp.float32))  # (S, hd)

    attn = jnp.concatenate(head_outs, axis=-1)                         # (S, D)

    # ---- distill / gate / output projection (same VMEM-resident tile) ----
    distilled = jnp.dot(attn.astype(cd), wd_ref[...],
                        preferred_element_type=jnp.float32) + bd_ref[...]
    x_mean = jnp.mean(x, axis=0, keepdims=True)                        # (1, D)
    g = jnp.dot(x_mean.astype(cd), wg1_ref[...],
                preferred_element_type=jnp.float32) + bg1_ref[...]
    g = 1.0 / (1.0 + jnp.exp(-g))          # exact sigmoid on a tiny (1,H*H) row
    g = jnp.dot(g.astype(cd), wgp_ref[...],
                preferred_element_type=jnp.float32) + bgp_ref[...]     # (1, D)
    mixed = g * distilled + (1.0 - g) * attn
    y = jnp.dot(mixed.astype(cd), wo_ref[...],
                preferred_element_type=jnp.float32) + bo_ref[...]      # (S, D)

    # ---- multi-scale attention pooling: logits matmul + one MXU contraction --
    logits = jnp.dot(y.astype(cd), wq_pool_ref[...],
                     preferred_element_type=jnp.float32) + bq_pool_ref[...]
    lmax = jnp.max(logits, axis=0, keepdims=True)                      # (1, n)
    e = jnp.exp(logits - lmax)
    w = e * pl.reciprocal(jnp.sum(e, axis=0, keepdims=True), approx=True)
    # all scales at once: contract sequence axis -> (n_scales, D)
    pooled = lax.dot_general(w.astype(cd), y.astype(cd),
                             (((0,), (0,)), ((), ())),
                             preferred_element_type=jnp.float32)
    out_ref[0] = pooled


# -----------------------------------------------------------------------------
# One-time parameter fusion: QKV stacking, attention-scale folding, weight cast.
# -----------------------------------------------------------------------------
def prepare_fused_params(params, num_heads, compute_dtype=jnp.bfloat16):
    D = params["wq"].shape[0]
    hd = D // num_heads
    scale = hd ** -0.5
    wqkv = jnp.concatenate([params["wq"] * scale, params["wk"], params["wv"]],
                           axis=1)
    bqkv = jnp.concatenate([params["bq"] * scale, params["bk"], params["bv"]],
                           axis=1)
    cd = compute_dtype
    return {
        "wqkv": wqkv.astype(cd), "bqkv": bqkv.astype(jnp.float32),
        "wd": params["wd"].astype(cd), "bd": params["bd"],
        "wg1": params["wg1"].astype(cd), "bg1": params["bg1"],
        "wgp": params["wgp"].astype(cd), "bgp": params["bgp"],
        "wo": params["wo"].astype(cd), "bo": params["bo"],
        "wq_pool": params["wq_pool"].astype(cd), "bq_pool": params["bq_pool"],
    }


def _default_vmem_limit():
    # Per-generation scoped-VMEM budget (~3/4 of physical: v5e/v6e ~96 MiB of
    # 128, v7x ~48 MiB of 64).  Fall back to the compiler default if the
    # hardware query is unavailable.
    try:
        cap = getattr(pltpu.get_tpu_info(), "vmem_capacity_bytes", None)
        if cap:
            return int(cap) * 3 // 4
    except Exception:
        return None
    return None


# -----------------------------------------------------------------------------
# Wrapper
# -----------------------------------------------------------------------------
def multi_scale_attention_pooling(x, fused, *, num_heads, scales, sparsity,
                                  vmem_limit_bytes=None):
    B, S, D = x.shape
    n_scales = len(scales)
    assert D % num_heads == 0
    # The original module's distill(... .view(-1, H*H)) is a clean per-token
    # linear only when dim == num_heads**2; we implement that case.
    # TODO(synk): general dim != num_heads**2 reinterprets memory across tokens
    # and is not implemented.
    assert D == num_heads * num_heads, "distill path requires dim == num_heads**2"

    # torch.quantile 'linear' interpolation: static order-statistic positions.
    qfrac = (100.0 - sparsity * 100.0) / 100.0
    pos = qfrac * (S - 1)
    i_lo = int(math.floor(pos))
    frac = float(pos - i_lo)
    if frac < 1e-9:            # snap mathematically-integral quantile positions
        frac = 0.0
    elif frac > 1.0 - 1e-9:
        i_lo += 1
        frac = 0.0
    i_lo = min(max(i_lo, 0), S - 1)
    m_lo = S - i_lo            # m_lo-th largest == ascending order stat i_lo

    kern = functools.partial(_msap_fused_kernel, num_heads=num_heads,
                             m_lo=int(m_lo), frac=frac)

    def full(a):  # whole-array block, resident across grid steps
        return pl.BlockSpec(a.shape, lambda b: (0,) * a.ndim)

    if vmem_limit_bytes is None:
        vmem_limit_bytes = _default_vmem_limit()
    cp_kwargs = dict(dimension_semantics=("parallel",))
    if vmem_limit_bytes is not None:
        cp_kwargs["vmem_limit_bytes"] = int(vmem_limit_bytes)

    r = pl.pallas_call(
        kern,
        out_shape=jax.ShapeDtypeStruct((B, n_scales, D), jnp.float32),
        grid=(B,),
        in_specs=[
            pl.BlockSpec((1, S, D), lambda b: (b, 0, 0)),
            full(fused["wqkv"]), full(fused["bqkv"]),
            full(fused["wd"]), full(fused["bd"]),
            full(fused["wg1"]), full(fused["bg1"]),
            full(fused["wgp"]), full(fused["bgp"]),
            full(fused["wo"]), full(fused["bo"]),
            full(fused["wq_pool"]), full(fused["bq_pool"]),
        ],
        out_specs=pl.BlockSpec((1, n_scales, D), lambda b: (b, 0, 0)),
        compiler_params=pltpu.CompilerParams(**cp_kwargs),
    )(x, fused["wqkv"], fused["bqkv"], fused["wd"], fused["bd"],
      fused["wg1"], fused["bg1"], fused["wgp"], fused["bgp"],
      fused["wo"], fused["bo"], fused["wq_pool"], fused["bq_pool"])

    # F.avg_pool1d(kernel=s, stride=s) acts on the feature axis and is linear,
    # so pooling the already-summed-over-sequence (B, D) results is identical.
    pooled = []
    for i, s in enumerate(scales):
        ri = r[:, i, :]
        li = (D // s) * s
        pooled.append(ri[:, :li].reshape(B, D // s, s).mean(axis=-1))
    return jnp.concatenate(pooled, axis=1)


# -----------------------------------------------------------------------------
# Deterministic parameter init (torch nn.Linear-style uniform(-1/sqrt(in), ..))
# -----------------------------------------------------------------------------
def init_params(key, D, num_heads, scales):
    HH = num_heads * num_heads
    n_scales = len(scales)
    keys = jax.random.split(key, 16)

    def u(k, shape, fan_in):
        bound = 1.0 / math.sqrt(fan_in)
        return jax.random.uniform(k, shape, jnp.float32, -bound, bound)

    return {
        "wq": u(keys[0], (D, D), D), "wk": u(keys[1], (D, D), D),
        "wv": u(keys[2], (D, D), D),
        "bq": u(keys[3], (1, D), D), "bk": u(keys[4], (1, D), D),
        "bv": u(keys[5], (1, D), D),
        "wd": u(keys[6], (HH, HH), HH), "bd": u(keys[7], (1, HH), HH),
        "wg1": u(keys[8], (D, HH), D), "bg1": u(keys[9], (1, HH), D),
        "wgp": u(keys[10], (HH, D), HH), "bgp": u(keys[11], (1, D), HH),
        "wo": u(keys[12], (D, D), D), "bo": u(keys[13], (1, D), D),
        "wq_pool": u(keys[14], (D, n_scales), D),
        "bq_pool": u(keys[15], (1, n_scales), D),
    }


# -----------------------------------------------------------------------------
# Pure-JAX reference (same math, jnp.quantile) for a sanity check.
# -----------------------------------------------------------------------------
def reference_forward(x, params, *, num_heads, scales, sparsity):
    B, S, D = x.shape
    hd = D // num_heads
    scale = hd ** -0.5
    q = x @ params["wq"] + params["bq"]
    k = x @ params["wk"] + params["bk"]
    v = x @ params["wv"] + params["bv"]
    Q = q.reshape(B, S, num_heads, hd).transpose(0, 2, 1, 3)
    K = k.reshape(B, S, num_heads, hd).transpose(0, 2, 1, 3)
    V = v.reshape(B, S, num_heads, hd).transpose(0, 2, 1, 3)
    scores = jnp.einsum('bhse,bhte->bhst', Q, K) * scale
    qv = (100.0 - sparsity * 100.0) / 100.0
    thr = jnp.quantile(scores, qv, axis=-1, keepdims=True)
    masked = jnp.where(scores >= thr, scores, -jnp.inf)
    probs = jax.nn.softmax(masked, axis=-1)
    attn = jnp.einsum('bhst,bhte->bhse', probs, V)
    attn_flat = attn.transpose(0, 2, 1, 3).reshape(B, S, D)
    distilled = attn_flat @ params["wd"] + params["bd"]
    g = jax.nn.sigmoid(x.mean(axis=1) @ params["wg1"] + params["bg1"])
    g = (g @ params["wgp"] + params["bgp"])[:, None, :]
    y = (g * distilled + (1.0 - g) * attn_flat) @ params["wo"] + params["bo"]
    logits = jnp.einsum('bsd,dn->bsn', y, params["wq_pool"]) + params["bq_pool"]
    outs = []
    for i, s in enumerate(scales):
        w = jax.nn.softmax(logits[:, :, i], axis=1)
        wz = w[:, :, None] * y
        li = (D // s) * s
        pooled = wz[:, :, :li].reshape(B, S, D // s, s).mean(axis=-1)
        outs.append(pooled.sum(axis=1))
    return jnp.concatenate(outs, axis=1)


if __name__ == "__main__":
    D, NUM_HEADS, SCALES = 16, 4, (1, 2, 4)
    assert D == NUM_HEADS * NUM_HEADS

    key = jax.random.PRNGKey(0)
    kx1, kx2, kp = jax.random.split(key, 3)
    params = init_params(kp, D, NUM_HEADS, SCALES)
    fused_f32 = prepare_fused_params(params, NUM_HEADS, compute_dtype=jnp.float32)

    # --- Config A: small top-m -> exact unrolled selection path (f32, tight) ---
    B, S, SP = 2, 8, 0.1
    x = jax.random.normal(kx1, (B, S, D), jnp.float32)
    out = multi_scale_attention_pooling(
        x, fused_f32, num_heads=NUM_HEADS, scales=SCALES, sparsity=SP)
    out = jax.block_until_ready(out)
    ref = reference_forward(x, params, num_heads=NUM_HEADS, scales=SCALES,
                            sparsity=SP)
    assert out.shape == (B, D + D // 2 + D // 4), out.shape
    err = float(jnp.max(jnp.abs(out - ref)))
    assert jnp.allclose(out, ref, rtol=5e-3, atol=5e-3), err

    # --- Config B: larger top-m -> 32-step bisection quantile path (f32) ---
    B2, S2, SP2 = 2, 16, 0.5
    x2 = jax.random.normal(kx2, (B2, S2, D), jnp.float32)
    out2 = multi_scale_attention_pooling(
        x2, fused_f32, num_heads=NUM_HEADS, scales=SCALES, sparsity=SP2)
    out2 = jax.block_until_ready(out2)
    ref2 = reference_forward(x2, params, num_heads=NUM_HEADS, scales=SCALES,
                             sparsity=SP2)
    err2 = float(jnp.max(jnp.abs(out2 - ref2)))
    assert jnp.allclose(out2, ref2, rtol=5e-3, atol=5e-3), err2

    # --- Config C: production default (bf16 MXU operands, f32 accumulation) ---
    # bf16 score rounding can flip elements near the sparsity threshold, so only
    # shape / finiteness is asserted against the f32 reference here.
    fused_bf16 = prepare_fused_params(params, NUM_HEADS)   # default bf16
    out3 = jax.block_until_ready(multi_scale_attention_pooling(
        x, fused_bf16, num_heads=NUM_HEADS, scales=SCALES, sparsity=SP))
    assert out3.shape == out.shape
    assert bool(jnp.all(jnp.isfinite(out3)))

    print("KERNEL_OK")
</pallas_src>

<mosaic_0001>
module attributes {stable_mosaic.version = 11 : i64} {
  func.func @_msap_fused_kernel(%arg0: i32, %arg1: memref<1x8x16xf32, #tpu.memory_space<vmem>>, %arg2: memref<16x48xf32, #tpu.memory_space<vmem>>, %arg3: memref<1x48xf32, #tpu.memory_space<vmem>>, %arg4: memref<16x16xf32, #tpu.memory_space<vmem>>, %arg5: memref<1x16xf32, #tpu.memory_space<vmem>>, %arg6: memref<16x16xf32, #tpu.memory_space<vmem>>, %arg7: memref<1x16xf32, #tpu.memory_space<vmem>>, %arg8: memref<16x16xf32, #tpu.memory_space<vmem>>, %arg9: memref<1x16xf32, #tpu.memory_space<vmem>>, %arg10: memref<16x16xf32, #tpu.memory_space<vmem>>, %arg11: memref<1x16xf32, #tpu.memory_space<vmem>>, %arg12: memref<16x3xf32, #tpu.memory_space<vmem>>, %arg13: memref<1x3xf32, #tpu.memory_space<vmem>>, %arg14: memref<1x3x16xf32, #tpu.memory_space<vmem>>) attributes {dimension_semantics = [#tpu.dimension_semantics<parallel>], iteration_bounds = array<i64: 2>, scalar_prefetch = 0 : i64, scratch_operands = 0 : i64, tpu.core_type = #tpu.core_type<tc>, window_params = [{transform_indices = @transform_0, window_bounds = array<i64: 1, 8, 16>}, {pipeline_mode = #tpu.pipeline_mode<synchronous>, transform_indices = @transform_1, window_bounds = array<i64: 16, 48>}, {pipeline_mode = #tpu.pipeline_mode<synchronous>, transform_indices = @transform_2, window_bounds = array<i64: 1, 48>}, {pipeline_mode = #tpu.pipeline_mode<synchronous>, transform_indices = @transform_3, window_bounds = array<i64: 16, 16>}, {pipeline_mode = #tpu.pipeline_mode<synchronous>, transform_indices = @transform_4, window_bounds = array<i64: 1, 16>}, {pipeline_mode = #tpu.pipeline_mode<synchronous>, transform_indices = @transform_5, window_bounds = array<i64: 16, 16>}, {pipeline_mode = #tpu.pipeline_mode<synchronous>, transform_indices = @transform_6, window_bounds = array<i64: 1, 16>}, {pipeline_mode = #tpu.pipeline_mode<synchronous>, transform_indices = @transform_7, window_bounds = array<i64: 16, 16>}, {pipeline_mode = #tpu.pipeline_mode<synchronous>, transform_indices = @transform_8, window_bounds = array<i64: 1, 16>}, {pipeline_mode = #tpu.pipeline_mode<synchronous>, transform_indices = @transform_9, window_bounds = array<i64: 16, 16>}, {pipeline_mode = #tpu.pipeline_mode<synchronous>, transform_indices = @transform_10, window_bounds = array<i64: 1, 16>}, {pipeline_mode = #tpu.pipeline_mode<synchronous>, transform_indices = @transform_11, window_bounds = array<i64: 16, 3>}, {pipeline_mode = #tpu.pipeline_mode<synchronous>, transform_indices = @transform_12, window_bounds = array<i64: 1, 3>}, {transform_indices = @transform_13, window_bounds = array<i64: 1, 3, 16>}]} {
    %c0 = arith.constant 0 : index
    %c0_0 = arith.constant 0 : index
    %c0_1 = arith.constant 0 : index
    %0 = vector.load %arg1[%c0, %c0_0, %c0_1] : memref<1x8x16xf32, #tpu.memory_space<vmem>>, vector<1x8x16xf32>
    %1 = vector.shape_cast %0 : vector<1x8x16xf32> to vector<8x16xf32>
    %c0_2 = arith.constant 0 : index
    %c0_3 = arith.constant 0 : index
    %2 = vector.load %arg2[%c0_2, %c0_3] : memref<16x48xf32, #tpu.memory_space<vmem>>, vector<16x48xf32>
    %cst = arith.constant dense<0.000000e+00> : vector<8x48xf32>
    %3 = tpu.matmul %1, %2, %cst {dimension_numbers = #tpu.dot_dimension_numbers<[1], [0], [0], [1], [0, 0, 1, 1], [], []>} : vector<8x16xf32>, vector<16x48xf32>, vector<8x48xf32> -> vector<8x48xf32>
    %c0_4 = arith.constant 0 : index
    %c0_5 = arith.constant 0 : index
    %4 = vector.load %arg3[%c0_4, %c0_5] : memref<1x48xf32, #tpu.memory_space<vmem>>, vector<1x48xf32>
    %5 = vector.broadcast %4 : vector<1x48xf32> to vector<8x48xf32>
    %6 = arith.addf %3, %5 : vector<8x48xf32>
    %7 = vector.extract_strided_slice %6 {offsets = [0, 0], sizes = [8, 16], strides = [1, 1]} : vector<8x48xf32> to vector<8x16xf32>
    %8 = vector.extract_strided_slice %6 {offsets = [0, 16], sizes = [8, 16], strides = [1, 1]} : vector<8x48xf32> to vector<8x16xf32>
    %9 = vector.extract_strided_slice %6 {offsets = [0, 32], sizes = [8, 16], strides = [1, 1]} : vector<8x48xf32> to vector<8x16xf32>
    %10 = vector.extract_strided_slice %7 {offsets = [0, 0], sizes = [8, 4], strides = [1, 1]} : vector<8x16xf32> to vector<8x4xf32>
    %11 = vector.extract_strided_slice %8 {offsets = [0, 0], sizes = [8, 4], strides = [1, 1]} : vector<8x16xf32> to vector<8x4xf32>
    %12 = vector.extract_strided_slice %9 {offsets = [0, 0], sizes = [8, 4], strides = [1, 1]} : vector<8x16xf32> to vector<8x4xf32>
    %cst_6 = arith.constant dense<0.000000e+00> : vector<8x8xf32>
    %13 = tpu.matmul %10, %11, %cst_6 {dimension_numbers = #tpu.dot_dimension_numbers<[1], [1], [0], [0], [0, 0, 1, 0], [], []>} : vector<8x4xf32>, vector<8x4xf32>, vector<8x8xf32> -> vector<8x8xf32>
    %cst_7 = arith.constant 0.000000e+00 : f32
    %14 = vector.broadcast %cst_7 : f32 to vector<8x1xf32>
    %cst_8 = arith.constant 0xFF800000 : f32
    %15 = vector.broadcast %cst_8 : f32 to vector<8x1xf32>
    %cst_9 = arith.constant dense<0xFF800000> : vector<8xf32>
    %16 = vector.multi_reduction <maximumf>, %13, %cst_9 [1] : vector<8x8xf32> to vector<8xf32>
    %17 = vector.shape_cast %16 : vector<8xf32> to vector<8x1xf32>
    %18 = vector.broadcast %17 : vector<8x1xf32> to vector<8x8xf32>
    %19 = arith.cmpf oeq, %13, %18 : vector<8x8xf32>
    %20 = arith.extui %19 : vector<8x8xi1> to vector<8x8xi32>
    %21 = arith.sitofp %20 : vector<8x8xi32> to vector<8x8xf32>
    %cst_10 = arith.constant dense<0.000000e+00> : vector<8xf32>
    %22 = vector.multi_reduction <add>, %21, %cst_10 [1] : vector<8x8xf32> to vector<8xf32>
    %23 = vector.shape_cast %22 : vector<8xf32> to vector<8x1xf32>
    %24 = arith.addf %14, %23 : vector<8x1xf32>
    %cst_11 = arith.constant 2.000000e+00 : f32
    %25 = vector.broadcast %cst_11 : f32 to vector<8x1xf32>
    %26 = arith.cmpf olt, %14, %25 : vector<8x1xf32>
    %cst_12 = arith.constant 2.000000e+00 : f32
    %27 = vector.broadcast %cst_12 : f32 to vector<8x1xf32>
    %28 = arith.cmpf oge, %24, %27 : vector<8x1xf32>
    %29 = arith.andi %26, %28 : vector<8x1xi1>
    %30 = arith.select %29, %17, %15 : vector<8x1xi1>, vector<8x1xf32>
    %cst_13 = arith.constant 1.000000e+00 : f32
    %31 = vector.broadcast %cst_13 : f32 to vector<8x1xf32>
    %32 = arith.cmpf olt, %14, %31 : vector<8x1xf32>
    %cst_14 = arith.constant 1.000000e+00 : f32
    %33 = vector.broadcast %cst_14 : f32 to vector<8x1xf32>
    %34 = arith.cmpf oge, %24, %33 : vector<8x1xf32>
    %35 = arith.andi %32, %34 : vector<8x1xi1>
    %36 = arith.select %35, %17, %15 : vector<8x1xi1>, vector<8x1xf32>
    %37 = vector.broadcast %17 : vector<8x1xf32> to vector<8x8xf32>
    %38 = arith.cmpf oeq, %13, %37 : vector<8x8xf32>
    %cst_15 = arith.constant 0xFF800000 : f32
    %39 = vector.broadcast %cst_15 : f32 to vector<8x8xf32>
    %40 = arith.select %38, %39, %13 : vector<8x8xi1>, vector<8x8xf32>
    %cst_16 = arith.constant dense<0xFF800000> : vector<8xf32>
    %41 = vector.multi_reduction <maximumf>, %40, %cst_16 [1] : vector<8x8xf32> to vector<8xf32>
    %42 = vector.shape_cast %41 : vector<8xf32> to vector<8x1xf32>
    %43 = vector.broadcast %42 : vector<8x1xf32> to vector<8x8xf32>
    %44 = arith.cmpf oeq, %40, %43 : vector<8x8xf32>
    %45 = arith.extui %44 : vector<8x8xi1> to vector<8x8xi32>
    %46 = arith.sitofp %45 : vector<8x8xi32> to vector<8x8xf32>
    %cst_17 = arith.constant dense<0.000000e+00> : vector<8xf32>
    %47 = vector.multi_reduction <add>, %46, %cst_17 [1] : vector<8x8xf32> to vector<8xf32>
    %48 = vector.shape_cast %47 : vector<8xf32> to vector<8x1xf32>
    %49 = arith.addf %24, %48 : vector<8x1xf32>
    %cst_18 = arith.constant 2.000000e+00 : f32
    %50 = vector.broadcast %cst_18 : f32 to vector<8x1xf32>
    %51 = arith.cmpf olt, %24, %50 : vector<8x1xf32>
    %cst_19 = arith.constant 2.000000e+00 : f32
    %52 = vector.broadcast %cst_19 : f32 to vector<8x1xf32>
    %53 = arith.cmpf oge, %49, %52 : vector<8x1xf32>
    %54 = arith.andi %51, %53 : vector<8x1xi1>
    %55 = arith.select %54, %42, %30 : vector<8x1xi1>, vector<8x1xf32>
    %cst_20 = arith.constant 1.000000e+00 : f32
    %56 = vector.broadcast %cst_20 : f32 to vector<8x1xf32>
    %57 = arith.cmpf olt, %24, %56 : vector<8x1xf32>
    %cst_21 = arith.constant 1.000000e+00 : f32
    %58 = vector.broadcast %cst_21 : f32 to vector<8x1xf32>
    %59 = arith.cmpf oge, %49, %58 : vector<8x1xf32>
    %60 = arith.andi %57, %59 : vector<8x1xi1>
    %61 = arith.select %60, %42, %36 : vector<8x1xi1>, vector<8x1xf32>
    %62 = arith.subf %61, %55 : vector<8x1xf32>
    %cst_22 = arith.constant 3.000000e-01 : f32
    %63 = vector.broadcast %cst_22 : f32 to vector<8x1xf32>
    %64 = arith.mulf %63, %62 : vector<8x1xf32>
    %65 = arith.addf %55, %64 : vector<8x1xf32>
    %66 = vector.broadcast %65 : vector<8x1xf32> to vector<8x8xf32>
    %67 = arith.cmpf oge, %13, %66 : vector<8x8xf32>
    %cst_23 = arith.constant 0xFF800000 : f32
    %68 = vector.broadcast %cst_23 : f32 to vector<8x8xf32>
    %69 = arith.select %67, %13, %68 : vector<8x8xi1>, vector<8x8xf32>
    %cst_24 = arith.constant dense<0xFF800000> : vector<8xf32>
    %70 = vector.multi_reduction <maximumf>, %69, %cst_24 [1] : vector<8x8xf32> to vector<8xf32>
    %71 = vector.shape_cast %70 : vector<8xf32> to vector<8x1xf32>
    %72 = vector.broadcast %71 : vector<8x1xf32> to vector<8x8xf32>
    %73 = arith.subf %69, %72 : vector<8x8xf32>
    %74 = math.exp %73 : vector<8x8xf32>
    %cst_25 = arith.constant dense<0.000000e+00> : vector<8xf32>
    %75 = vector.multi_reduction <add>, %74, %cst_25 [1] : vector<8x8xf32> to vector<8xf32>
    %76 = vector.shape_cast %75 : vector<8xf32> to vector<8x1xf32>
    %77 = tpu.reciprocal %76 {approx = true} : vector<8x1xf32> -> vector<8x1xf32>
    %78 = vector.broadcast %77 : vector<8x1xf32> to vector<8x8xf32>
    %79 = arith.mulf %74, %78 : vector<8x8xf32>
    %cst_26 = arith.constant dense<0.000000e+00> : vector<8x4xf32>
    %80 = tpu.matmul %79, %12, %cst_26 {dimension_numbers = #tpu.dot_dimension_numbers<[1], [0], [0], [1], [0, 0, 1, 1], [], []>} : vector<8x8xf32>, vector<8x4xf32>, vector<8x4xf32> -> vector<8x4xf32>
    %81 = vector.extract_strided_slice %7 {offsets = [0, 4], sizes = [8, 4], strides = [1, 1]} : vector<8x16xf32> to vector<8x4xf32>
    %82 = vector.extract_strided_slice %8 {offsets = [0, 4], sizes = [8, 4], strides = [1, 1]} : vector<8x16xf32> to vector<8x4xf32>
    %83 = vector.extract_strided_slice %9 {offsets = [0, 4], sizes = [8, 4], strides = [1, 1]} : vector<8x16xf32> to vector<8x4xf32>
    %cst_27 = arith.constant dense<0.000000e+00> : vector<8x8xf32>
    %84 = tpu.matmul %81, %82, %cst_27 {dimension_numbers = #tpu.dot_dimension_numbers<[1], [1], [0], [0], [0, 0, 1, 0], [], []>} : vector<8x4xf32>, vector<8x4xf32>, vector<8x8xf32> -> vector<8x8xf32>
    %cst_28 = arith.constant 0.000000e+00 : f32
    %85 = vector.broadcast %cst_28 : f32 to vector<8x1xf32>
    %cst_29 = arith.constant 0xFF800000 : f32
    %86 = vector.broadcast %cst_29 : f32 to vector<8x1xf32>
    %cst_30 = arith.constant dense<0xFF800000> : vector<8xf32>
    %87 = vector.multi_reduction <maximumf>, %84, %cst_30 [1] : vector<8x8xf32> to vector<8xf32>
    %88 = vector.shape_cast %87 : vector<8xf32> to vector<8x1xf32>
    %89 = vector.broadcast %88 : vector<8x1xf32> to vector<8x8xf32>
    %90 = arith.cmpf oeq, %84, %89 : vector<8x8xf32>
    %91 = arith.extui %90 : vector<8x8xi1> to vector<8x8xi32>
    %92 = arith.sitofp %91 : vector<8x8xi32> to vector<8x8xf32>
    %cst_31 = arith.constant dense<0.000000e+00> : vector<8xf32>
    %93 = vector.multi_reduction <add>, %92, %cst_31 [1] : vector<8x8xf32> to vector<8xf32>
    %94 = vector.shape_cast %93 : vector<8xf32> to vector<8x1xf32>
    %95 = arith.addf %85, %94 : vector<8x1xf32>
    %cst_32 = arith.constant 2.000000e+00 : f32
    %96 = vector.broadcast %cst_32 : f32 to vector<8x1xf32>
    %97 = arith.cmpf olt, %85, %96 : vector<8x1xf32>
    %cst_33 = arith.constant 2.000000e+00 : f32
    %98 = vector.broadcast %cst_33 : f32 to vector<8x1xf32>
    %99 = arith.cmpf oge, %95, %98 : vector<8x1xf32>
    %100 = arith.andi %97, %99 : vector<8x1xi1>
    %101 = arith.select %100, %88, %86 : vector<8x1xi1>, vector<8x1xf32>
    %cst_34 = arith.constant 1.000000e+00 : f32
    %102 = vector.broadcast %cst_34 : f32 to vector<8x1xf32>
    %103 = arith.cmpf olt, %85, %102 : vector<8x1xf32>
    %cst_35 = arith.constant 1.000000e+00 : f32
    %104 = vector.broadcast %cst_35 : f32 to vector<8x1xf32>
    %105 = arith.cmpf oge, %95, %104 : vector<8x1xf32>
    %106 = arith.andi %103, %105 : vector<8x1xi1>
    %107 = arith.select %106, %88, %86 : vector<8x1xi1>, vector<8x1xf32>
    %108 = vector.broadcast %88 : vector<8x1xf32> to vector<8x8xf32>
    %109 = arith.cmpf oeq, %84, %108 : vector<8x8xf32>
    %cst_36 = arith.constant 0xFF800000 : f32
    %110 = vector.broadcast %cst_36 : f32 to vector<8x8xf32>
    %111 = arith.select %109, %110, %84 : vector<8x8xi1>, vector<8x8xf32>
    %cst_37 = arith.constant dense<0xFF800000> : vector<8xf32>
    %112 = vector.multi_reduction <maximumf>, %111, %cst_37 [1] : vector<8x8xf32> to vector<8xf32>
    %113 = vector.shape_cast %112 : vector<8xf32> to vector<8x1xf32>
    %114 = vector.broadcast %113 : vector<8x1xf32> to vector<8x8xf32>
    %115 = arith.cmpf oeq, %111, %114 : vector<8x8xf32>
    %116 = arith.extui %115 : vector<8x8xi1> to vector<8x8xi32>
    %117 = arith.sitofp %116 : vector<8x8xi32> to vector<8x8xf32>
    %cst_38 = arith.constant dense<0.000000e+00> : vector<8xf32>
    %118 = vector.multi_reduction <add>, %117, %cst_38 [1] : vector<8x8xf32> to vector<8xf32>
    %119 = vector.shape_cast %118 : vector<8xf32> to vector<8x1xf32>
    %120 = arith.addf %95, %119 : vector<8x1xf32>
    %cst_39 = arith.constant 2.000000e+00 : f32
    %121 = vector.broadcast %cst_39 : f32 to vector<8x1xf32>
    %122 = arith.cmpf olt, %95, %121 : vector<8x1xf32>
    %cst_40 = arith.constant 2.000000e+00 : f32
    %123 = vector.broadcast %cst_40 : f32 to vector<8x1xf32>
    %124 = arith.cmpf oge, %120, %123 : vector<8x1xf32>
    %125 = arith.andi %122, %124 : vector<8x1xi1>
    %126 = arith.select %125, %113, %101 : vector<8x1xi1>, vector<8x1xf32>
    %cst_41 = arith.constant 1.000000e+00 : f32
    %127 = vector.broadcast %cst_41 : f32 to vector<8x1xf32>
    %128 = arith.cmpf olt, %95, %127 : vector<8x1xf32>
    %cst_42 = arith.constant 1.000000e+00 : f32
    %129 = vector.broadcast %cst_42 : f32 to vector<8x1xf32>
    %130 = arith.cmpf oge, %120, %129 : vector<8x1xf32>
    %131 = arith.andi %128, %130 : vector<8x1xi1>
    %132 = arith.select %131, %113, %107 : vector<8x1xi1>, vector<8x1xf32>
    %133 = arith.subf %132, %126 : vector<8x1xf32>
    %cst_43 = arith.constant 3.000000e-01 : f32
    %134 = vector.broadcast %cst_43 : f32 to vector<8x1xf32>
    %135 = arith.mulf %134, %133 : vector<8x1xf32>
    %136 = arith.addf %126, %135 : vector<8x1xf32>
    %137 = vector.broadcast %136 : vector<8x1xf32> to vector<8x8xf32>
    %138 = arith.cmpf oge, %84, %137 : vector<8x8xf32>
    %cst_44 = arith.constant 0xFF800000 : f32
    %139 = vector.broadcast %cst_44 : f32 to vector<8x8xf32>
    %140 = arith.select %138, %84, %139 : vector<8x8xi1>, vector<8x8xf32>
    %cst_45 = arith.constant dense<0xFF800000> : vector<8xf32>
    %141 = vector.multi_reduction <maximumf>, %140, %cst_45 [1] : vector<8x8xf32> to vector<8xf32>
    %142 = vector.shape_cast %141 : vector<8xf32> to vector<8x1xf32>
    %143 = vector.broadcast %142 : vector<8x1xf32> to vector<8x8xf32>
    %144 = arith.subf %140, %143 : vector<8x8xf32>
    %145 = math.exp %144 : vector<8x8xf32>
    %cst_46 = arith.constant dense<0.000000e+00> : vector<8xf32>
    %146 = vector.multi_reduction <add>, %145, %cst_46 [1] : vector<8x8xf32> to vector<8xf32>
    %147 = vector.shape_cast %146 : vector<8xf32> to vector<8x1xf32>
    %148 = tpu.reciprocal %147 {approx = true} : vector<8x1xf32> -> vector<8x1xf32>
    %149 = vector.broadcast %148 : vector<8x1xf32> to vector<8x8xf32>
    %150 = arith.mulf %145, %149 : vector<8x8xf32>
    %cst_47 = arith.constant dense<0.000000e+00> : vector<8x4xf32>
    %151 = tpu.matmul %150, %83, %cst_47 {dimension_numbers = #tpu.dot_dimension_numbers<[1], [0], [0], [1], [0, 0, 1, 1], [], []>} : vector<8x8xf32>, vector<8x4xf32>, vector<8x4xf32> -> vector<8x4xf32>
    %152 = vector.extract_strided_slice %7 {offsets = [0, 8], sizes = [8, 4], strides = [1, 1]} : vector<8x16xf32> to vector<8x4xf32>
    %153 = vector.extract_strided_slice %8 {offsets = [0, 8], sizes = [8, 4], strides = [1, 1]} : vector<8x16xf32> to vector<8x4xf32>
    %154 = vector.extract_strided_slice %9 {offsets = [0, 8], sizes = [8, 4], strides = [1, 1]} : vector<8x16xf32> to vector<8x4xf32>
    %cst_48 = arith.constant dense<0.000000e+00> : vector<8x8xf32>
    %155 = tpu.matmul %152, %153, %cst_48 {dimension_numbers = #tpu.dot_dimension_numbers<[1], [1], [0], [0], [0, 0, 1, 0], [], []>} : vector<8x4xf32>, vector<8x4xf32>, vector<8x8xf32> -> vector<8x8xf32>
    %cst_49 = arith.constant 0.000000e+00 : f32
    %156 = vector.broadcast %cst_49 : f32 to vector<8x1xf32>
    %cst_50 = arith.constant 0xFF800000 : f32
    %157 = vector.broadcast %cst_50 : f32 to vector<8x1xf32>
    %cst_51 = arith.constant dense<0xFF800000> : vector<8xf32>
    %158 = vector.multi_reduction <maximumf>, %155, %cst_51 [1] : vector<8x8xf32> to vector<8xf32>
    %159 = vector.shape_cast %158 : vector<8xf32> to vector<8x1xf32>
    %160 = vector.broadcast %159 : vector<8x1xf32> to vector<8x8xf32>
    %161 = arith.cmpf oeq, %155, %160 : vector<8x8xf32>
    %162 = arith.extui %161 : vector<8x8xi1> to vector<8x8xi32>
    %163 = arith.sitofp %162 : vector<8x8xi32> to vector<8x8xf32>
    %cst_52 = arith.constant dense<0.000000e+00> : vector<8xf32>
    %164 = vector.multi_reduction <add>, %163, %cst_52 [1] : vector<8x8xf32> to vector<8xf32>
    %165 = vector.shape_cast %164 : vector<8xf32> to vector<8x1xf32>
    %166 = arith.addf %156, %165 : vector<8x1xf32>
    %cst_53 = arith.constant 2.000000e+00 : f32
    %167 = vector.broadcast %cst_53 : f32 to vector<8x1xf32>
    %168 = arith.cmpf olt, %156, %167 : vector<8x1xf32>
    %cst_54 = arith.constant 2.000000e+00 : f32
    %169 = vector.broadcast %cst_54 : f32 to vector<8x1xf32>
    %170 = arith.cmpf oge, %166, %169 : vector<8x1xf32>
    %171 = arith.andi %168, %170 : vector<8x1xi1>
    %172 = arith.select %171, %159, %157 : vector<8x1xi1>, vector<8x1xf32>
    %cst_55 = arith.constant 1.000000e+00 : f32
    %173 = vector.broadcast %cst_55 : f32 to vector<8x1xf32>
    %174 = arith.cmpf olt, %156, %173 : vector<8x1xf32>
    %cst_56 = arith.constant 1.000000e+00 : f32
    %175 = vector.broadcast %cst_56 : f32 to vector<8x1xf32>
    %176 = arith.cmpf oge, %166, %175 : vector<8x1xf32>
    %177 = arith.andi %174, %176 : vector<8x1xi1>
    %178 = arith.select %177, %159, %157 : vector<8x1xi1>, vector<8x1xf32>
    %179 = vector.broadcast %159 : vector<8x1xf32> to vector<8x8xf32>
    %180 = arith.cmpf oeq, %155, %179 : vector<8x8xf32>
    %cst_57 = arith.constant 0xFF800000 : f32
    %181 = vector.broadcast %cst_57 : f32 to vector<8x8xf32>
    %182 = arith.select %180, %181, %155 : vector<8x8xi1>, vector<8x8xf32>
    %cst_58 = arith.constant dense<0xFF800000> : vector<8xf32>
    %183 = vector.multi_reduction <maximumf>, %182, %cst_58 [1] : vector<8x8xf32> to vector<8xf32>
    %184 = vector.shape_cast %183 : vector<8xf32> to vector<8x1xf32>
    %185 = vector.broadcast %184 : vector<8x1xf32> to vector<8x8xf32>
    %186 = arith.cmpf oeq, %182, %185 : vector<8x8xf32>
    %187 = arith.extui %186 : vector<8x8xi1> to vector<8x8xi32>
    %188 = arith.sitofp %187 : vector<8x8xi32> to vector<8x8xf32>
    %cst_59 = arith.constant dense<0.000000e+00> : vector<8xf32>
    %189 = vector.multi_reduction <add>, %188, %cst_59 [1] : vector<8x8xf32> to vector<8xf32>
    %190 = vector.shape_cast %189 : vector<8xf32> to vector<8x1xf32>
    %191 = arith.addf %166, %190 : vector<8x1xf32>
    %cst_60 = arith.constant 2.000000e+00 : f32
    %192 = vector.broadcast %cst_60 : f32 to vector<8x1xf32>
    %193 = arith.cmpf olt, %166, %192 : vector<8x1xf32>
    %cst_61 = arith.constant 2.000000e+00 : f32
    %194 = vector.broadcast %cst_61 : f32 to vector<8x1xf32>
    %195 = arith.cmpf oge, %191, %194 : vector<8x1xf32>
    %196 = arith.andi %193, %195 : vector<8x1xi1>
    %197 = arith.select %196, %184, %172 : vector<8x1xi1>, vector<8x1xf32>
    %cst_62 = arith.constant 1.000000e+00 : f32
    %198 = vector.broadcast %cst_62 : f32 to vector<8x1xf32>
    %199 = arith.cmpf olt, %166, %198 : vector<8x1xf32>
    %cst_63 = arith.constant 1.000000e+00 : f32
    %200 = vector.broadcast %cst_63 : f32 to vector<8x1xf32>
    %201 = arith.cmpf oge, %191, %200 : vector<8x1xf32>
    %202 = arith.andi %199, %201 : vector<8x1xi1>
    %203 = arith.select %202, %184, %178 : vector<8x1xi1>, vector<8x1xf32>
    %204 = arith.subf %203, %197 : vector<8x1xf32>
    %cst_64 = arith.constant 3.000000e-01 : f32
    %205 = vector.broadcast %cst_64 : f32 to vector<8x1xf32>
    %206 = arith.mulf %205, %204 : vector<8x1xf32>
    %207 = arith.addf %197, %206 : vector<8x1xf32>
    %208 = vector.broadcast %207 : vector<8x1xf32> to vector<8x8xf32>
    %209 = arith.cmpf oge, %155, %208 : vector<8x8xf32>
    %cst_65 = arith.constant 0xFF800000 : f32
    %210 = vector.broadcast %cst_65 : f32 to vector<8x8xf32>
    %211 = arith.select %209, %155, %210 : vector<8x8xi1>, vector<8x8xf32>
    %cst_66 = arith.constant dense<0xFF800000> : vector<8xf32>
    %212 = vector.multi_reduction <maximumf>, %211, %cst_66 [1] : vector<8x8xf32> to vector<8xf32>
    %213 = vector.shape_cast %212 : vector<8xf32> to vector<8x1xf32>
    %214 = vector.broadcast %213 : vector<8x1xf32> to vector<8x8xf32>
    %215 = arith.subf %211, %214 : vector<8x8xf32>
    %216 = math.exp %215 : vector<8x8xf32>
    %cst_67 = arith.constant dense<0.000000e+00> : vector<8xf32>
    %217 = vector.multi_reduction <add>, %216, %cst_67 [1] : vector<8x8xf32> to vector<8xf32>
    %218 = vector.shape_cast %217 : vector<8xf32> to vector<8x1xf32>
    %219 = tpu.reciprocal %218 {approx = true} : vector<8x1xf32> -> vector<8x1xf32>
    %220 = vector.broadcast %219 : vector<8x1xf32> to vector<8x8xf32>
    %221 = arith.mulf %216, %220 : vector<8x8xf32>
    %cst_68 = arith.constant dense<0.000000e+00> : vector<8x4xf32>
    %222 = tpu.matmul %221, %154, %cst_68 {dimension_numbers = #tpu.dot_dimension_numbers<[1], [0], [0], [1], [0, 0, 1, 1], [], []>} : vector<8x8xf32>, vector<8x4xf32>, vector<8x4xf32> -> vector<8x4xf32>
    %223 = vector.extract_strided_slice %7 {offsets = [0, 12], sizes = [8, 4], strides = [1, 1]} : vector<8x16xf32> to vector<8x4xf32>
    %224 = vector.extract_strided_slice %8 {offsets = [0, 12], sizes = [8, 4], strides = [1, 1]} : vector<8x16xf32> to vector<8x4xf32>
    %225 = vector.extract_strided_slice %9 {offsets = [0, 12], sizes = [8, 4], strides = [1, 1]} : vector<8x16xf32> to vector<8x4xf32>
    %cst_69 = arith.constant dense<0.000000e+00> : vector<8x8xf32>
    %226 = tpu.matmul %223, %224, %cst_69 {dimension_numbers = #tpu.dot_dimension_numbers<[1], [1], [0], [0], [0, 0, 1, 0], [], []>} : vector<8x4xf32>, vector<8x4xf32>, vector<8x8xf32> -> vector<8x8xf32>
    %cst_70 = arith.constant 0.000000e+00 : f32
    %227 = vector.broadcast %cst_70 : f32 to vector<8x1xf32>
    %cst_71 = arith.constant 0xFF800000 : f32
    %228 = vector.broadcast %cst_71 : f32 to vector<8x1xf32>
    %cst_72 = arith.constant dense<0xFF800000> : vector<8xf32>
    %229 = vector.multi_reduction <maximumf>, %226, %cst_72 [1] : vector<8x8xf32> to vector<8xf32>
    %230 = vector.shape_cast %229 : vector<8xf32> to vector<8x1xf32>
    %231 = vector.broadcast %230 : vector<8x1xf32> to vector<8x8xf32>
    %232 = arith.cmpf oeq, %226, %231 : vector<8x8xf32>
    %233 = arith.extui %232 : vector<8x8xi1> to vector<8x8xi32>
    %234 = arith.sitofp %233 : vector<8x8xi32> to vector<8x8xf32>
    %cst_73 = arith.constant dense<0.000000e+00> : vector<8xf32>
    %235 = vector.multi_reduction <add>, %234, %cst_73 [1] : vector<8x8xf32> to vector<8xf32>
    %236 = vector.shape_cast %235 : vector<8xf32> to vector<8x1xf32>
    %237 = arith.addf %227, %236 : vector<8x1xf32>
    %cst_74 = arith.constant 2.000000e+00 : f32
    %238 = vector.broadcast %cst_74 : f32 to vector<8x1xf32>
    %239 = arith.cmpf olt, %227, %238 : vector<8x1xf32>
    %cst_75 = arith.constant 2.000000e+00 : f32
    %240 = vector.broadcast %cst_75 : f32 to vector<8x1xf32>
    %241 = arith.cmpf oge, %237, %240 : vector<8x1xf32>
    %242 = arith.andi %239, %241 : vector<8x1xi1>
    %243 = arith.select %242, %230, %228 : vector<8x1xi1>, vector<8x1xf32>
    %cst_76 = arith.constant 1.000000e+00 : f32
    %244 = vector.broadcast %cst_76 : f32 to vector<8x1xf32>
    %245 = arith.cmpf olt, %227, %244 : vector<8x1xf32>
    %cst_77 = arith.constant 1.000000e+00 : f32
    %246 = vector.broadcast %cst_77 : f32 to vector<8x1xf32>
    %247 = arith.cmpf oge, %237, %246 : vector<8x1xf32>
    %248 = arith.andi %245, %247 : vector<8x1xi1>
    %249 = arith.select %248, %230, %228 : vector<8x1xi1>, vector<8x1xf32>
    %250 = vector.broadcast %230 : vector<8x1xf32> to vector<8x8xf32>
    %251 = arith.cmpf oeq, %226, %250 : vector<8x8xf32>
    %cst_78 = arith.constant 0xFF800000 : f32
    %252 = vector.broadcast %cst_78 : f32 to vector<8x8xf32>
    %253 = arith.select %251, %252, %226 : vector<8x8xi1>, vector<8x8xf32>
    %cst_79 = arith.constant dense<0xFF800000> : vector<8xf32>
    %254 = vector.multi_reduction <maximumf>, %253, %cst_79 [1] : vector<8x8xf32> to vector<8xf32>
    %255 = vector.shape_cast %254 : vector<8xf32> to vector<8x1xf32>
    %256 = vector.broadcast %255 : vector<8x1xf32> to vector<8x8xf32>
    %257 = arith.cmpf oeq, %253, %256 : vector<8x8xf32>
    %258 = arith.extui %257 : vector<8x8xi1> to vector<8x8xi32>
    %259 = arith.sitofp %258 : vector<8x8xi32> to vector<8x8xf32>
    %cst_80 = arith.constant dense<0.000000e+00> : vector<8xf32>
    %260 = vector.multi_reduction <add>, %259, %cst_80 [1] : vector<8x8xf32> to vector<8xf32>
    %261 = vector.shape_cast %260 : vector<8xf32> to vector<8x1xf32>
    %262 = arith.addf %237, %261 : vector<8x1xf32>
    %cst_81 = arith.constant 2.000000e+00 : f32
    %263 = vector.broadcast %cst_81 : f32 to vector<8x1xf32>
    %264 = arith.cmpf olt, %237, %263 : vector<8x1xf32>
    %cst_82 = arith.constant 2.000000e+00 : f32
    %265 = vector.broadcast %cst_82 : f32 to vector<8x1xf32>
    %266 = arith.cmpf oge, %262, %265 : vector<8x1xf32>
    %267 = arith.andi %264, %266 : vector<8x1xi1>
    %268 = arith.select %267, %255, %243 : vector<8x1xi1>, vector<8x1xf32>
    %cst_83 = arith.constant 1.000000e+00 : f32
    %269 = vector.broadcast %cst_83 : f32 to vector<8x1xf32>
    %270 = arith.cmpf olt, %237, %269 : vector<8x1xf32>
    %cst_84 = arith.constant 1.000000e+00 : f32
    %271 = vector.broadcast %cst_84 : f32 to vector<8x1xf32>
    %272 = arith.cmpf oge, %262, %271 : vector<8x1xf32>
    %273 = arith.andi %270, %272 : vector<8x1xi1>
    %274 = arith.select %273, %255, %249 : vector<8x1xi1>, vector<8x1xf32>
    %275 = arith.subf %274, %268 : vector<8x1xf32>
    %cst_85 = arith.constant 3.000000e-01 : f32
    %276 = vector.broadcast %cst_85 : f32 to vector<8x1xf32>
    %277 = arith.mulf %276, %275 : vector<8x1xf32>
    %278 = arith.addf %268, %277 : vector<8x1xf32>
    %279 = vector.broadcast %278 : vector<8x1xf32> to vector<8x8xf32>
    %280 = arith.cmpf oge, %226, %279 : vector<8x8xf32>
    %cst_86 = arith.constant 0xFF800000 : f32
    %281 = vector.broadcast %cst_86 : f32 to vector<8x8xf32>
    %282 = arith.select %280, %226, %281 : vector<8x8xi1>, vector<8x8xf32>
    %cst_87 = arith.constant dense<0xFF800000> : vector<8xf32>
    %283 = vector.multi_reduction <maximumf>, %282, %cst_87 [1] : vector<8x8xf32> to vector<8xf32>
    %284 = vector.shape_cast %283 : vector<8xf32> to vector<8x1xf32>
    %285 = vector.broadcast %284 : vector<8x1xf32> to vector<8x8xf32>
    %286 = arith.subf %282, %285 : vector<8x8xf32>
    %287 = math.exp %286 : vector<8x8xf32>
    %cst_88 = arith.constant dense<0.000000e+00> : vector<8xf32>
    %288 = vector.multi_reduction <add>, %287, %cst_88 [1] : vector<8x8xf32> to vector<8xf32>
    %289 = vector.shape_cast %288 : vector<8xf32> to vector<8x1xf32>
    %290 = tpu.reciprocal %289 {approx = true} : vector<8x1xf32> -> vector<8x1xf32>
    %291 = vector.broadcast %290 : vector<8x1xf32> to vector<8x8xf32>
    %292 = arith.mulf %287, %291 : vector<8x8xf32>
    %cst_89 = arith.constant dense<0.000000e+00> : vector<8x4xf32>
    %293 = tpu.matmul %292, %225, %cst_89 {dimension_numbers = #tpu.dot_dimension_numbers<[1], [0], [0], [1], [0, 0, 1, 1], [], []>} : vector<8x8xf32>, vector<8x4xf32>, vector<8x4xf32> -> vector<8x4xf32>
    %294 = tpu.concatenate %80, %151, %222, %293 in 1 : vector<8x4xf32>, vector<8x4xf32>, vector<8x4xf32>, vector<8x4xf32> -> vector<8x16xf32>
    %c0_90 = arith.constant 0 : index
    %c0_91 = arith.constant 0 : index
    %295 = vector.load %arg4[%c0_90, %c0_91] : memref<16x16xf32, #tpu.memory_space<vmem>>, vector<16x16xf32>
    %cst_92 = arith.constant dense<0.000000e+00> : vector<8x16xf32>
    %296 = tpu.matmul %294, %295, %cst_92 {dimension_numbers = #tpu.dot_dimension_numbers<[1], [0], [0], [1], [0, 0, 1, 1], [], []>} : vector<8x16xf32>, vector<16x16xf32>, vector<8x16xf32> -> vector<8x16xf32>
    %c0_93 = arith.constant 0 : index
    %c0_94 = arith.constant 0 : index
    %297 = vector.load %arg5[%c0_93, %c0_94] : memref<1x16xf32, #tpu.memory_space<vmem>>, vector<1x16xf32>
    %298 = vector.broadcast %297 : vector<1x16xf32> to vector<8x16xf32>
    %299 = arith.addf %296, %298 : vector<8x16xf32>
    %cst_95 = arith.constant dense<0.000000e+00> : vector<16xf32>
    %300 = vector.multi_reduction <add>, %1, %cst_95 [0] : vector<8x16xf32> to vector<16xf32>
    %301 = vector.shape_cast %300 : vector<16xf32> to vector<1x16xf32>
    %cst_96 = arith.constant 8.000000e+00 : f32
    %302 = vector.broadcast %cst_96 : f32 to vector<1x16xf32>
    %303 = arith.divf %301, %302 : vector<1x16xf32>
    %c0_97 = arith.constant 0 : index
    %c0_98 = arith.constant 0 : index
    %304 = vector.load %arg6[%c0_97, %c0_98] : memref<16x16xf32, #tpu.memory_space<vmem>>, vector<16x16xf32>
    %cst_99 = arith.constant dense<0.000000e+00> : vector<1x16xf32>
    %305 = tpu.matmul %303, %304, %cst_99 {dimension_numbers = #tpu.dot_dimension_numbers<[1], [0], [0], [1], [0, 0, 1, 1], [], []>} : vector<1x16xf32>, vector<16x16xf32>, vector<1x16xf32> -> vector<1x16xf32>
    %c0_100 = arith.constant 0 : index
    %c0_101 = arith.constant 0 : index
    %306 = vector.load %arg7[%c0_100, %c0_101] : memref<1x16xf32, #tpu.memory_space<vmem>>, vector<1x16xf32>
    %307 = arith.addf %305, %306 : vector<1x16xf32>
    %cst_102 = arith.constant 0.000000e+00 : f32
    %308 = vector.broadcast %cst_102 : f32 to vector<1x16xf32>
    %309 = arith.subf %308, %307 : vector<1x16xf32>
    %310 = math.exp %309 : vector<1x16xf32>
    %cst_103 = arith.constant 1.000000e+00 : f32
    %311 = vector.broadcast %cst_103 : f32 to vector<1x16xf32>
    %312 = arith.addf %311, %310 : vector<1x16xf32>
    %cst_104 = arith.constant 1.000000e+00 : f32
    %313 = vector.broadcast %cst_104 : f32 to vector<1x16xf32>
    %314 = arith.divf %313, %312 : vector<1x16xf32>
    %c0_105 = arith.constant 0 : index
    %c0_106 = arith.constant 0 : index
    %315 = vector.load %arg8[%c0_105, %c0_106] : memref<16x16xf32, #tpu.memory_space<vmem>>, vector<16x16xf32>
    %cst_107 = arith.constant dense<0.000000e+00> : vector<1x16xf32>
    %316 = tpu.matmul %314, %315, %cst_107 {dimension_numbers = #tpu.dot_dimension_numbers<[1], [0], [0], [1], [0, 0, 1, 1], [], []>} : vector<1x16xf32>, vector<16x16xf32>, vector<1x16xf32> -> vector<1x16xf32>
    %c0_108 = arith.constant 0 : index
    %c0_109 = arith.constant 0 : index
    %317 = vector.load %arg9[%c0_108, %c0_109] : memref<1x16xf32, #tpu.memory_space<vmem>>, vector<1x16xf32>
    %318 = arith.addf %316, %317 : vector<1x16xf32>
    %319 = vector.broadcast %318 : vector<1x16xf32> to vector<8x16xf32>
    %320 = arith.mulf %319, %299 : vector<8x16xf32>
    %cst_110 = arith.constant 1.000000e+00 : f32
    %321 = vector.broadcast %cst_110 : f32 to vector<1x16xf32>
    %322 = arith.subf %321, %318 : vector<1x16xf32>
    %323 = vector.broadcast %322 : vector<1x16xf32> to vector<8x16xf32>
    %324 = arith.mulf %323, %294 : vector<8x16xf32>
    %325 = arith.addf %320, %324 : vector<8x16xf32>
    %c0_111 = arith.constant 0 : index
    %c0_112 = arith.constant 0 : index
    %326 = vector.load %arg10[%c0_111, %c0_112] : memref<16x16xf32, #tpu.memory_space<vmem>>, vector<16x16xf32>
    %cst_113 = arith.constant dense<0.000000e+00> : vector<8x16xf32>
    %327 = tpu.matmul %325, %326, %cst_113 {dimension_numbers = #tpu.dot_dimension_numbers<[1], [0], [0], [1], [0, 0, 1, 1], [], []>} : vector<8x16xf32>, vector<16x16xf32>, vector<8x16xf32> -> vector<8x16xf32>
    %c0_114 = arith.constant 0 : index
    %c0_115 = arith.constant 0 : index
    %328 = vector.load %arg11[%c0_114, %c0_115] : memref<1x16xf32, #tpu.memory_space<vmem>>, vector<1x16xf32>
    %329 = vector.broadcast %328 : vector<1x16xf32> to vector<8x16xf32>
    %330 = arith.addf %327, %329 : vector<8x16xf32>
    %c0_116 = arith.constant 0 : index
    %c0_117 = arith.constant 0 : index
    %331 = vector.load %arg12[%c0_116, %c0_117] : memref<16x3xf32, #tpu.memory_space<vmem>>, vector<16x3xf32>
    %cst_118 = arith.constant dense<0.000000e+00> : vector<8x3xf32>
    %332 = tpu.matmul %330, %331, %cst_118 {dimension_numbers = #tpu.dot_dimension_numbers<[1], [0], [0], [1], [0, 0, 1, 1], [], []>} : vector<8x16xf32>, vector<16x3xf32>, vector<8x3xf32> -> vector<8x3xf32>
    %c0_119 = arith.constant 0 : index
    %c0_120 = arith.constant 0 : index
    %333 = vector.load %arg13[%c0_119, %c0_120] : memref<1x3xf32, #tpu.memory_space<vmem>>, vector<1x3xf32>
    %334 = vector.broadcast %333 : vector<1x3xf32> to vector<8x3xf32>
    %335 = arith.addf %332, %334 : vector<8x3xf32>
    %cst_121 = arith.constant dense<0xFF800000> : vector<3xf32>
    %336 = vector.multi_reduction <maximumf>, %335, %cst_121 [0] : vector<8x3xf32> to vector<3xf32>
    %337 = vector.shape_cast %336 : vector<3xf32> to vector<1x3xf32>
    %338 = vector.broadcast %337 : vector<1x3xf32> to vector<8x3xf32>
    %339 = arith.subf %335, %338 : vector<8x3xf32>
    %340 = math.exp %339 : vector<8x3xf32>
    %cst_122 = arith.constant dense<0.000000e+00> : vector<3xf32>
    %341 = vector.multi_reduction <add>, %340, %cst_122 [0] : vector<8x3xf32> to vector<3xf32>
    %342 = vector.shape_cast %341 : vector<3xf32> to vector<1x3xf32>
    %343 = tpu.reciprocal %342 {approx = true} : vector<1x3xf32> -> vector<1x3xf32>
    %344 = vector.broadcast %343 : vector<1x3xf32> to vector<8x3xf32>
    %345 = arith.mulf %340, %344 : vector<8x3xf32>
    %cst_123 = arith.constant dense<0.000000e+00> : vector<3x16xf32>
    %346 = tpu.matmul %345, %330, %cst_123 {dimension_numbers = #tpu.dot_dimension_numbers<[0], [0], [1], [1], [0, 1, 1, 1], [], []>} : vector<8x3xf32>, vector<8x16xf32>, vector<3x16xf32> -> vector<3x16xf32>
    %c0_124 = arith.constant 0 : index
    %c0_125 = arith.constant 0 : index
    %c0_126 = arith.constant 0 : index
    %347 = vector.load %arg14[%c0_124, %c0_125, %c0_126] : memref<1x3x16xf32, #tpu.memory_space<vmem>>, vector<1x3x16xf32>
    %348 = vector.shape_cast %347 : vector<1x3x16xf32> to vector<3x16xf32>
    %349 = vector.shape_cast %346 : vector<3x16xf32> to vector<1x3x16xf32>
    tpu.vector_store %arg14[%c0_124, %c0_125, %c0_126], %349 {strides = array<i32>} : memref<1x3x16xf32, #tpu.memory_space<vmem>>, vector<1x3x16xf32>,
    return
  }
  func.func @transform_0(%arg0: i32) -> (i32, i32, i32) {
    %c0_i32 = arith.constant 0 : i32
    %c0_i32_0 = arith.constant 0 : i32
    %c0_i32_1 = arith.constant 0 : i32
    return %arg0, %c0_i32, %c0_i32_0 : i32, i32, i32
  }
  func.func @transform_1(%arg0: i32) -> (i32, i32) {
    %c0_i32 = arith.constant 0 : i32
    %c0_i32_0 = arith.constant 0 : i32
    %c0_i32_1 = arith.constant 0 : i32
    return %c0_i32, %c0_i32_0 : i32, i32
  }
  func.func @transform_2(%arg0: i32) -> (i32, i32) {
    %c0_i32 = arith.constant 0 : i32
    %c0_i32_0 = arith.constant 0 : i32
    %c0_i32_1 = arith.constant 0 : i32
    return %c0_i32, %c0_i32_0 : i32, i32
  }
  func.func @transform_3(%arg0: i32) -> (i32, i32) {
    %c0_i32 = arith.constant 0 : i32
    %c0_i32_0 = arith.constant 0 : i32
    %c0_i32_1 = arith.constant 0 : i32
    return %c0_i32, %c0_i32_0 : i32, i32
  }
  func.func @transform_4(%arg0: i32) -> (i32, i32) {
    %c0_i32 = arith.constant 0 : i32
    %c0_i32_0 = arith.constant 0 : i32
    %c0_i32_1 = arith.constant 0 : i32
    return %c0_i32, %c0_i32_0 : i32, i32
  }
  func.func @transform_5(%arg0: i32) -> (i32, i32) {
    %c0_i32 = arith.constant 0 : i32
    %c0_i32_0 = arith.constant 0 : i32
    %c0_i32_1 = arith.constant 0 : i32
    return %c0_i32, %c0_i32_0 : i32, i32
  }
  func.func @transform_6(%arg0: i32) -> (i32, i32) {
    %c0_i32 = arith.constant 0 : i32
    %c0_i32_0 = arith.constant 0 : i32
    %c0_i32_1 = arith.constant 0 : i32
    return %c0_i32, %c0_i32_0 : i32, i32
  }
  func.func @transform_7(%arg0: i32) -> (i32, i32) {
    %c0_i32 = arith.constant 0 : i32
    %c0_i32_0 = arith.constant 0 : i32
    %c0_i32_1 = arith.constant 0 : i32
    return %c0_i32, %c0_i32_0 : i32, i32
  }
  func.func @transform_8(%arg0: i32) -> (i32, i32) {
    %c0_i32 = arith.constant 0 : i32
    %c0_i32_0 = arith.constant 0 : i32
    %c0_i32_1 = arith.constant 0 : i32
    return %c0_i32, %c0_i32_0 : i32, i32
  }
  func.func @transform_9(%arg0: i32) -> (i32, i32) {
    %c0_i32 = arith.constant 0 : i32
    %c0_i32_0 = arith.constant 0 : i32
    %c0_i32_1 = arith.constant 0 : i32
    return %c0_i32, %c0_i32_0 : i32, i32
  }
  func.func @transform_10(%arg0: i32) -> (i32, i32) {
    %c0_i32 = arith.constant 0 : i32
    %c0_i32_0 = arith.constant 0 : i32
    %c0_i32_1 = arith.constant 0 : i32
    return %c0_i32, %c0_i32_0 : i32, i32
  }
  func.func @transform_11(%arg0: i32) -> (i32, i32) {
    %c0_i32 = arith.constant 0 : i32
    %c0_i32_0 = arith.constant 0 : i32
    %c0_i32_1 = arith.constant 0 : i32
    return %c0_i32, %c0_i32_0 : i32, i32
  }
  func.func @transform_12(%arg0: i32) -> (i32, i32) {
    %c0_i32 = arith.constant 0 : i32
    %c0_i32_0 = arith.constant 0 : i32
    %c0_i32_1 = arith.constant 0 : i32
    return %c0_i32, %c0_i32_0 : i32, i32
  }
  func.func @transform_13(%arg0: i32) -> (i32, i32, i32) {
    %c0_i32 = arith.constant 0 : i32
    %c0_i32_0 = arith.constant 0 : i32
    %c0_i32_1 = arith.constant 0 : i32
    return %arg0, %c0_i32, %c0_i32_0 : i32, i32, i32
  }
}

</mosaic_0001>

<bundles_post_ra>
// kernel: tpu_custom_call.1
= control target key start
LH: loop header
LB: loop body
LE: loop exit
PB: predicated region body
PF: predicated region fallthrough
CT: control target
= control target key end

     0   :  { %s2017_s0 = inlined_call_operand.vmem [shape: f32[2,8,16], index: 0, kind: input, shape index: {}]   ;;  %s2018_s1 = inlined_call_operand.hbm [shape: f32[16,48], index: 1, kind: input, shape index: {}]   ;;  %s2019_s2 = inlined_call_operand.vmem [shape: f32[1,48], index: 2, kind: input, shape index: {}]   ;;  %s2020_s3 = inlined_call_operand.hbm [shape: f32[16,16], index: 3, kind: input, shape index: {}]   ;;  %s2021_s4 = inlined_call_operand.vmem [shape: f32[1,16], index: 4, kind: input, shape index: {}]   ;;  %s2022_s5 = inlined_call_operand.hbm [shape: f32[16,16], index: 5, kind: input, shape index: {}]   ;;  %s2023_s6 = inlined_call_operand.vmem [shape: f32[1,16], index: 6, kind: input, shape index: {}]   ;;  %s2024_s7 = inlined_call_operand.hbm [shape: f32[16,16], index: 7, kind: input, shape index: {}]   ;;  %s2025_s8 = inlined_call_operand.vmem [shape: f32[1,16], index: 8, kind: input, shape index: {}]   ;;  %s2026_s9 = inlined_call_operand.hbm [shape: f32[16,16], index: 9, kind: input, shape index: {}]   ;;  %s2027_s10 = inlined_call_operand.vmem [shape: f32[1,16], index: 10, kind: input, shape index: {}]   ;;  %s2028_s11 = inlined_call_operand.vmem [shape: f32[16,3], index: 11, kind: input, shape index: {}]   ;;  %s2029_s12 = inlined_call_operand.vmem [shape: f32[1,3], index: 12, kind: input, shape index: {}]   ;;  %s2030_s13 = inlined_call_operand.vmem [shape: f32[2,3,16], index: 13, kind: output, shape index: {}]  }
   0x1   :  { %2033 = sst [smem:[#allocation13_spill]] %s2018_s1 }
   0x2   :  { %2034 = sst [smem:[#allocation14_spill]] %s2020_s3 }
   0x3   :  { %2035 = sst [smem:[#allocation15_spill]] %s2024_s7 }
   0x4   :  { %18 = vsyncpa [#allocation3], 0 }
   0x5   :  { %19 = vsyncpa [#allocation5], 0 }
   0x6   :  { %20 = vsyncpa [#allocation8], 0  ;;  %s1764_s25 = smov 0  }
   0x7 LB: > { %s1770_s26 = sadd.s32 4294967295, %s1669_s25   ;;  %p1350_p0 = scmp.ge.s32.totalorder %s1669_s25, 1  ;;  %s1669_s25 = sphi %s1764_s25, %s26_s25  }
   0x8   : > { %p335_p1 = scmp.lt.s32.totalorder %s1669_s25, 3  ;;  %p1430_p2 = scmp.eq.s32.totalorder %s1770_s26, 0 }
   0x9   : > { %s2036_s3 = sld [smem:[#allocation14_spill]]  ;;  %s1671_s17 = smov [#allocation4]  }
   0xa   : > { %p1778_p3 = pnand %p1350_p0, %p335_p1  ;;  %s2038_s7 = sld [smem:[#allocation15_spill]] }
   0xb   : > { %s365_s18 = sshll.u32 %s1671_s17, 4  ;;  %s1672_s20 = smov [#allocation7]   ;;  %s366_s18 = int_to_ptr.vmem [resolvable:$true] %s365_s18 }
   0xc   : > { %p1414_p4 = pneg %p1778_p3  ;;  %s399_s21 = sshll.u32 %s1672_s20, 4  ;;  %s400_s21 = int_to_ptr.vmem [resolvable:$true] %s399_s21 }
   0xd   : > { %s2040_s1 = sld [smem:[#allocation13_spill]]  ;;  %s1673_s27 = smov 128  }
   0xe   : > { %p1789_p5 = pnand %p1430_p2, %p1414_p4  ;;  %s1674_s28 = smov 8  }
   0xf   : > { %s363_s29 = sshll.u32 %s2036_s3, 4  ;;  %s1675_s14 = smov [#allocation2]   ;;  %s364_s29 = int_to_ptr.hbm [resolvable:$true] %s363_s29 }
  0x10   : > { %s397_s16 = sshll.u32 %s2038_s7, 4  ;;  %s348_s15 = sshll.u32 %s1675_s14, 4  ;;  %s398_s16 = int_to_ptr.hbm [resolvable:$true] %s397_s16  ;;  %s349_s15 = int_to_ptr.vmem [resolvable:$true] %s348_s15 }
  0x11   : > { %1420 = dma.hbm_to_vmem [thread:$0]  (!%p1789_p5), %s364_s29, 256, %s366_s18, [#allocation5], %s1673_s27, %s1673_s27, %s1674_s28  }
  0x12   : > { %1426 = dma.hbm_to_vmem [thread:$0]  (!%p1789_p5), %s398_s16, 256, %s400_s21, [#allocation8], %s1673_s27, %s1673_s27, %s1674_s28  }
  0x13   : > { %s346_s24 = sshll.u32 %s2040_s1, 4  ;;  %s380_s20 = sshll.u32 %s2022_s5, 4  ;;  %s347_s24 = int_to_ptr.hbm [resolvable:$true] %s346_s24  ;;  %s381_s20 = int_to_ptr.hbm [resolvable:$true] %s380_s20 }
  0x14   : > { %1417 = dma.hbm_to_vmem [thread:$0]  (!%p1789_p5), %s347_s24, 256, %s349_s15, [#allocation3], %s1673_s27, %s1673_s27, %s1674_s28  }
  0x15   : > { %s414_s1 = sshll.u32 %s2026_s9, 4  ;;  %s1676_s7 = smov [#allocation6]   ;;  %s415_s1 = int_to_ptr.hbm [resolvable:$true] %s414_s1 }
  0x16   : > { %s382_s29 = sshll.u32 %s1676_s7, 4  ;;  %s1677_s16 = smov [#allocation9]   ;;  %s383_s29 = int_to_ptr.vmem [resolvable:$true] %s382_s29 }
  0x17   : > { %1423 = dma.hbm_to_vmem [thread:$0]  (!%p1789_p5), %s381_s20, 256, %s383_s29, [#allocation5], %s1673_s27, %s1673_s27, %s1674_s28  }
  0x18   : > { %s416_s18 = sshll.u32 %s1677_s16, 4  ;;  %448 = sbr.rel (%p1778_p3) target bundleno = 2045 (0x7fd), region = 72  ;;  %s417_s18 = int_to_ptr.vmem [resolvable:$true] %s416_s18 }
  0x19   : > { %1429 = dma.hbm_to_vmem [thread:$0]  (!%p1789_p5), %s415_s1, 256, %s417_s18, [#allocation8], %s1673_s27, %s1673_s27, %s1674_s28  }
  0x1d   : > { %1656 = dma.done.wait (%p1430_p2), [#allocation3], 256  }
  0x1e   : > { %1658 = vsyncadd (%p1430_p2), [#allocation3], 4294967040 }
  0x1f   : > { %1660 = dma.done.wait (%p1430_p2), [#allocation5], 512  }
  0x20   : > { %1662 = vsyncadd (%p1430_p2), [#allocation5], 4294966784 }
  0x21   : > { %1664 = dma.done.wait (%p1430_p2), [#allocation8], 512  }
  0x22   : > { %1666 = vsyncadd (%p1430_p2), [#allocation8], 4294966784  ;;  %p511_p6 = scmp.lt.s32.totalorder %s1770_s26, 1  ;;  %v521_v0 = vld [vmem:[#allocation2 + $0x8] sm:$0xff]  ;;  %v520_v1 = vld [vmem:[#allocation2] sm:$0xff]  ;;  %vm2032_vm0 = vcmask 130048  }
  0x23   : > { %544 = vmatpush.msra.mxu0 %v521_v0  ;;  %v1471_v3 = vld [vmem:[%s2019_s2] ss:$0 sm:$0xff]  ;;  %s1678_s24 = smov 104   ;;  %s1679_s27 = smov 124   ;;  %vm2031_vm1 = vcmask 31744   ;;  %vm578_vm2 = vcmask 64512  }
  0x24   : > { %s2049_s26 = smov (!%p511_p6, %s1770_s26), 1  ;;  %s1680_s28 = smov 112   ;;  %v1685_v31 = vmov 0.0  }
  0x25   : > { %s1363_s1 = sshll.u32 %s2049_s26, 3  ;;  %545 = vmatpush.msra.mxu0 %v520_v1  ;;  %s1681_s14 = smov 116  }
  0x26   : > { %s514_s30 = scalar_lea.vmem %s2017_s0, %s1363_s1  ;;  %s1682_s15 = smov 100  }
  0x27   : > { %v1834_v2 = vld [vmem:[%s514_s30] sm:$0xff]  ;;  %s1683_s17 = smov 108   ;;  %s1684_s20 = smov 120  }
  0x28   : > { %1365 = vmatmul.msk.f32.vlgmr.msra.gmra.mxu0 %vm2032_vm0, %v1834_v2  ;;  %s1686_s22 = smov 96   ;;  %s1687_s23 = smov 84  }
  0x29   : > { %s1688_s29 = smov 92   ;;  %s1689_s16 = smov 88  }
  0x2a   : > { %s1691_s18 = smov 4   ;;  %s1692_s1 = smov 12  }
  0x2b   : > { %s1693_s3 = smov 8  }
  0xa5   : > { %v547_v4 = vpop.f32.mrf.mxu0 }
  0xa6   : > { %v1841_v5 = vadd.f32 %v1471_v3, %v547_v4 }
  0xa8   : > { %765 = vrot.lane.b32.xlu2 %v1841_v5, %s1678_s24  ;;  %658 = vrot.lane.b32.xlu1 %v1841_v5, %s1679_s27 }
  0xa9   : > { %551 = vrot.lane.b32.xlu0 %v1841_v5, %s1680_s28 }
  0xb0   : > { %868 = vrot.lane.b32.xlu2 %v1841_v5, %s1681_s14  ;;  %870 = vrot.lane.b32.xlu1 %v1841_v5, %s1682_s15 }
  0xb1   : > { %660 = vrot.lane.b32.xlu0 %v1841_v5, %s1683_s17 }
  0xb9   : > { %763 = vrot.lane.b32.xlu0 %v1841_v5, %s1684_s20 }
 0x102   : > { %v766_v6 = vpop.permute.xlu2 %765 }
 0x103   : > { %1376 = vmatpush.xpose.msk.msrb.mxu0 %vm2031_vm1, %v766_v6 }
 0x10a   : > { %v869_v12 = vpop.permute.xlu2 %868 }
 0x11a   : > { %v659_v7 = vpop.permute.xlu1 %658 }
 0x11b   : > { %v552_v8 = vpop.permute.xlu0 %551 }
 0x11c   : > { %1366 = vmatpush.xpose.msk.msra.mxu1 %vm2031_vm1, %v552_v8 }
 0x11f   : > { %1367 = vmatmul.msk.f32.vlgmr.msra.gmra.mxu1 %vm2031_vm1, %v1841_v5 }
 0x122   : > { %v871_v9 = vpop.permute.xlu1 %870 }
 0x123   : > { %v661_v10 = vpop.permute.xlu0 %660 }
 0x124   : > { %1371 = vmatpush.xpose.msk.msra.mxu3 %vm2031_vm1, %v661_v10 }
 0x127   : > { %1372 = vmatmul.msk.f32.vlgmr.msra.gmra.mxu3 %vm2031_vm1, %v659_v7 }
 0x128   : > { %1381 = vmatpush.xpose.msk.msrb.mxu3 %vm2031_vm1, %v871_v9 }
 0x12b   : > { %v764_v11 = vpop.permute.xlu0 %763 }
 0x12c   : > { %1377 = vmatmul.msk.f32.vlgmr.msrb.gmra.mxu0 %vm2031_vm1, %v764_v11 }
 0x12f   : > { %1382 = vmatmul.msk.f32.vlgmr.msrb.gmra.mxu3 %vm2031_vm1, %v869_v12 }
 0x19c   : > { %v1859_v13 = vpop.f32.mrf.mxu1 }
 0x19d   : > { %v579_v14 = vsel %vm578_vm2, %v1859_v13, -inf }
 0x19e   : > { %580 = vmax.xlane.f32.xlu1 %v579_v14 }
 0x1a9   : > { %v1863_v15 = vpop.f32.mrf.mxu0 }
 0x1aa   : > { %v1865_v16 = vpop.f32.mrf.mxu3  ;;  %v791_v17 = vsel %vm578_vm2, %v1863_v15, -inf }
 0x1ab   : > { %792 = vmax.xlane.f32.xlu0 %v791_v17  ;;  %v686_v18 = vsel %vm578_vm2, %v1865_v16, -inf }
 0x1ac   : > { %687 = vmax.xlane.f32.xlu2 %v686_v18 }
 0x1b2   : > { %v1871_v19 = vpop.f32.mrf.mxu3 }
 0x1b3   : > { %v896_v20 = vsel %vm578_vm2, %v1871_v19, -inf }
 0x1b4   : > { %897 = vmax.xlane.f32.xlu2 %v896_v20 }
 0x211   : > { %v1875_v21 = vpop.xlane.xlu1 %580 }
 0x212   : > { %vm582_vm3 = vcmp.eq.f32.partialorder %v1859_v13, %v1875_v21 }
 0x213   : > { %v597_v22 = vsel %vm582_vm3, -inf, %v1859_v13  ;;  %v1368_v32 = vsel %vm582_vm3, 1.0, %v1685_v31 }
 0x214   : > { %v598_v23 = vsel %vm578_vm2, %v597_v22, -inf  ;;  %v585_v34 = vsel %vm578_vm2, %v1368_v32, 0.0 }
 0x215   : > { %599 = vmax.xlane.f32.xlu1 %v598_v23 }
 0x21e   : > { %v1884_v24 = vpop.xlane.xlu0 %792 }
 0x21f   : > { %v1886_v25 = vpop.xlane.xlu2 %687  ;;  %vm794_vm4 = vcmp.eq.f32.partialorder %v1863_v15, %v1884_v24 }
 0x220   : > { %v807_v26 = vsel %vm794_vm4, -inf, %v1863_v15  ;;  %vm689_vm5 = vcmp.eq.f32.partialorder %v1865_v16, %v1886_v25  ;;  %v1378_v41 = vsel %vm794_vm4, 1.0, %v1685_v31 }
 0x221   : > { %v808_v27 = vsel %vm578_vm2, %v807_v26, -inf  ;;  %v702_v28 = vsel %vm689_vm5, -inf, %v1865_v16  ;;  %v1373_v36 = vsel %vm689_vm5, 1.0, %v1685_v31  ;;  %v797_v42 = vsel %vm578_vm2, %v1378_v41, 0.0 }
 0x222   : > { %809 = vmax.xlane.f32.xlu0 %v808_v27  ;;  %v703_v29 = vsel %vm578_vm2, %v702_v28, -inf  ;;  %v692_v37 = vsel %vm578_vm2, %v1373_v36, 0.0 }
 0x223   : > { %704 = vmax.xlane.f32.xlu2 %v703_v29 }
 0x227   : > { %v1899_v30 = vpop.xlane.xlu2 %897 }
 0x228   : > { %vm899_vm6 = vcmp.eq.f32.partialorder %v1871_v19, %v1899_v30 }
 0x229   : > { %v912_v33 = vsel %vm899_vm6, -inf, %v1871_v19  ;;  %v1383_v50 = vsel %vm899_vm6, 1.0, %v1685_v31 }
 0x22a   : > { %v913_v35 = vsel %vm578_vm2, %v912_v33, -inf  ;;  %v902_v52 = vsel %vm578_vm2, %v1383_v50, 0.0 }
 0x22b   : > { %586 = vadd.xlane.f32.xlu2 %v585_v34  ;;  %914 = vmax.xlane.f32.xlu1 %v913_v35 }
 0x233   : > { %693 = vadd.xlane.f32.xlu1 %v692_v37 }
 0x288   : > { %v600_v38 = vpop.xlane.xlu1 %599 }
 0x289   : > { %vm601_vm7 = vcmp.eq.f32.partialorder %v597_v22, %v600_v38 }
 0x28a   : > { %v1369_v39 = vsel %vm601_vm7, 1.0, %v1685_v31 }
 0x28b   : > { %v604_v40 = vsel %vm578_vm2, %v1369_v39, 0.0 }
 0x28c   : > { %605 = vadd.xlane.f32.xlu0 %v604_v40 }
 0x294   : > { %798 = vadd.xlane.f32.xlu0 %v797_v42 }
 0x295   : > { %v1918_v43 = vpop.xlane.xlu0 %809 }
 0x296   : > { %v1920_v44 = vpop.xlane.xlu2 %704  ;;  %vm811_vm8 = vcmp.eq.f32.partialorder %v807_v26, %v1918_v43 }
 0x297   : > { %v1379_v45 = vsel %vm811_vm8, 1.0, %v1685_v31  ;;  %vm706_vm9 = vcmp.eq.f32.partialorder %v702_v28, %v1920_v44 }
 0x298   : > { %v814_v46 = vsel %vm578_vm2, %v1379_v45, 0.0  ;;  %v1374_v47 = vsel %vm706_vm9, 1.0, %v1685_v31 }
 0x299   : > { %815 = vadd.xlane.f32.xlu1 %v814_v46  ;;  %v709_v48 = vsel %vm578_vm2, %v1374_v47, 0.0 }
 0x29a   : > { %710 = vadd.xlane.f32.xlu2 %v709_v48 }
 0x29e   : > { %v1926_v49 = vpop.xlane.xlu1 %914  ;;  %v587_v54 = vpop.xlane.xlu2 %586 }
 0x29f   : > { %vm916_vm10 = vcmp.eq.f32.partialorder %v912_v33, %v1926_v49  ;;  %vm590_vm11 = vcmp.ge.f32.partialorder %v587_v54, 2.0  ;;  %vm594_vm12 = vcmp.ge.f32.partialorder %v587_v54, 1.0  ;;  %vm608_vm13 = vcmp.lt.f32.partialorder %v587_v54, 2.0 }
 0x2a0   : > { %v1384_v51 = vsel %vm916_vm10, 1.0, %v1685_v31  ;;  %vm612_vm3 = vcmp.lt.f32.partialorder %v587_v54, 1.0  ;;  %v592_v57 = vsel %vm590_vm11, %v1875_v21, -inf  ;;  %v596_v59 = vsel %vm594_vm12, %v1875_v21, -inf }
 0x2a1   : > { %v919_v53 = vsel %vm578_vm2, %v1384_v51, 0.0 }
 0x2a2   : > { %903 = vadd.xlane.f32.xlu2 %v902_v52  ;;  %920 = vadd.xlane.f32.xlu0 %v919_v53 }
 0x2a6   : > { %v694_v58 = vpop.xlane.xlu1 %693 }
 0x2a7   : > { %vm696_vm6 = vcmp.ge.f32.partialorder %v694_v58, 2.0  ;;  %vm699_vm9 = vcmp.ge.f32.partialorder %v694_v58, 1.0  ;;  %vm713_vm1 = vcmp.lt.f32.partialorder %v694_v58, 2.0 }
 0x2a8   : > { %v698_v14 = vsel %vm696_vm6, %v1886_v25, -inf  ;;  %v701_v17 = vsel %vm699_vm9, %v1886_v25, -inf }
 0x2ff   : > { %v606_v55 = vpop.xlane.xlu0 %605 }
 0x300   : > { %v607_v56 = vadd.f32 %v606_v55, %v587_v54 }
 0x302   : > { %vm609_vm14 = vcmp.ge.f32.partialorder %v607_v56, 2.0  ;;  %vm613_vm15 = vcmp.ge.f32.partialorder %v607_v56, 1.0 }
 0x303   : > { %vm610_vm4 = vmand %vm608_vm13, %vm609_vm14 }
 0x304   : > { %vm614_vm5 = vmand %vm612_vm3, %vm613_vm15  ;;  %v611_v60 = vsel %vm610_vm4, %v600_v38, %v592_v57 }
 0x305   : > { %v615_v61 = vsel %vm614_vm5, %v600_v38, %v596_v59 }
 0x306   : > { %v616_v62 = vsub.f32 %v615_v61, %v611_v60 }
 0x307   : > { %v799_v0 = vpop.xlane.xlu0 %798 }
 0x308   : > { %v617_v63 = vmul.f32 0.3, %v616_v62  ;;  %vm801_vm7 = vcmp.ge.f32.partialorder %v799_v0, 2.0  ;;  %vm804_vm10 = vcmp.ge.f32.partialorder %v799_v0, 1.0  ;;  %vm818_vm11 = vcmp.lt.f32.partialorder %v799_v0, 2.0 }
 0x309   : > { %vm822_vm15 = vcmp.lt.f32.partialorder %v799_v0, 1.0  ;;  %v803_v10 = vsel %vm801_vm7, %v1884_v24, -inf  ;;  %v806_v11 = vsel %vm804_vm10, %v1884_v24, -inf }
 0x30a   : > { %v618_v1 = vadd.f32 %v617_v63, %v611_v60 }
 0x30c   : > { %v816_v3 = vpop.xlane.xlu1 %815  ;;  %vm619_vm8 = vcmp.ge.f32.partialorder %v1859_v13, %v618_v1 }
 0x30d   : > { %v817_v4 = vadd.f32 %v816_v3, %v799_v0  ;;  %v711_v6 = vpop.xlane.xlu2 %710  ;;  %v1938_v8 = vsel %vm619_vm8, %v1859_v13, -inf  ;;  %vm717_vm8 = vcmp.lt.f32.partialorder %v694_v58, 1.0  ;;  %v1690_v3 = vmov 8.0  }
 0x30e   : > { %v712_v7 = vadd.f32 %v711_v6, %v694_v58  ;;  %v621_v9 = vsel %vm578_vm2, %v1938_v8, -inf }
 0x30f   : > { %vm819_vm12 = vcmp.ge.f32.partialorder %v817_v4, 2.0  ;;  %vm823_vm13 = vcmp.ge.f32.partialorder %v817_v4, 1.0  ;;  %622 = vmax.xlane.f32.xlu1 %v621_v9 }
 0x310   : > { %vm820_vm14 = vmand %vm818_vm11, %vm819_vm12  ;;  %vm714_vm3 = vcmp.ge.f32.partialorder %v712_v7, 2.0  ;;  %vm718_vm4 = vcmp.ge.f32.partialorder %v712_v7, 1.0 }
 0x311   : > { %vm824_vm5 = vmand %vm822_vm15, %vm823_vm13  ;;  %v821_v12 = vsel %vm820_vm14, %v1918_v43, %v803_v10 }
 0x312   : > { %v825_v13 = vsel %vm824_vm5, %v1918_v43, %v806_v11  ;;  %vm715_vm0 = vmand %vm713_vm1, %vm714_vm3 }
 0x313   : > { %vm719_vm11 = vmand %vm717_vm8, %vm718_vm4  ;;  %v826_v18 = vsub.f32 %v825_v13, %v821_v12  ;;  %v716_v20 = vsel %vm715_vm0, %v1920_v44, %v698_v14  ;;  %vm2041_vm4 = vcmask 130048  }
 0x314   : > { %v720_v21 = vsel %vm719_vm11, %v1920_v44, %v701_v17  ;;  %v1018_v4 = vsel %vm2041_vm4, %v1834_v2, 0.0  ;;  %vm2042_vm8 = vmmov %vm2041_vm4 }
 0x315   : > { %v904_v22 = vpop.xlane.xlu2 %903  ;;  %v921_v23 = vpop.xlane.xlu0 %920  ;;  %v827_v24 = vmul.f32 0.3, %v826_v18  ;;  %v721_v26 = vsub.f32 %v720_v21, %v716_v20  ;;  %v1019_v10 = vrot.slane %v1018_v4, 4 }
 0x316   : > { %vm906_vm7 = vcmp.ge.f32.partialorder %v904_v22, 2.0  ;;  %v922_v27 = vadd.f32 %v921_v23, %v904_v22  ;;  %vm909_vm1 = vcmp.ge.f32.partialorder %v904_v22, 1.0  ;;  %vm923_vm10 = vcmp.lt.f32.partialorder %v904_v22, 2.0 }
 0x317   : > { %v828_v28 = vadd.f32 %v827_v24, %v821_v12  ;;  %v722_v29 = vmul.f32 0.3, %v721_v26  ;;  %vm927_vm13 = vcmp.lt.f32.partialorder %v904_v22, 1.0  ;;  %v908_v32 = vsel %vm906_vm7, %v1899_v30, -inf }
 0x318   : > { %vm924_vm6 = vcmp.ge.f32.partialorder %v922_v27, 2.0  ;;  %vm928_vm12 = vcmp.ge.f32.partialorder %v922_v27, 1.0  ;;  %v911_v33 = vsel %vm909_vm1, %v1899_v30, -inf  ;;  %v1020_v12 = vadd.f32 %v1019_v10, %v1018_v4 }
 0x319   : > { %vm829_vm9 = vcmp.ge.f32.partialorder %v1863_v15, %v828_v28  ;;  %v723_v25 = vadd.f32 %v722_v29, %v716_v20  ;;  %vm925_vm14 = vmand %vm923_vm10, %vm924_vm6  ;;  %v1034_v28 = vld [vmem:[#allocation6 + $0x8] sm:$0xff] }
 0x31a   : > { %v830_v31 = vsel %vm829_vm9, %v1863_v15, -inf  ;;  %vm929_vm0 = vmand %vm927_vm13, %vm928_vm12  ;;  %v926_v35 = vsel %vm925_vm14, %v1926_v49, %v908_v32  ;;  %v1021_v18 = vrot.slane %v1020_v12, 2  ;;  %vm987_vm12 = vcmask 97280  }
 0x31b   : > { %v831_v34 = vsel %vm578_vm2, %v830_v31, -inf  ;;  %vm724_vm15 = vcmp.ge.f32.partialorder %v1865_v16, %v723_v25  ;;  %v930_v36 = vsel %vm929_vm0, %v1926_v49, %v911_v33  ;;  %v1033_v25 = vld [vmem:[#allocation6] sm:$0xff]  ;;  %vm2043_vm6 = vmmov %vm2041_vm4  ;;  %vm2044_vm9 = vcmask 31744  }
 0x31c   : > { %832 = vmax.xlane.f32.xlu0 %v831_v34  ;;  %v725_v37 = vsel %vm724_vm15, %v1865_v16, -inf  ;;  %v931_v39 = vsub.f32 %v930_v36, %v926_v35  ;;  %v1022_v2 = vadd.f32 %v1021_v18, %v1020_v12  ;;  %v1079_v36 = vld [vmem:[#allocation7 + $0x8] sm:$0xff]  ;;  %vm2045_vm13 = vmmov %vm2041_vm4  ;;  %v1139_v12 = vld [vmem:[%s2028_s11] sm:$0xff]  ;;  %vm1168_vm15 = vcmask 23552  }
 0x31d   : > { %v726_v38 = vsel %vm578_vm2, %v725_v37, -inf  ;;  %1098 = vmatpush.msra.mxu3 %v1079_v36  ;;  %vm2046_vm14 = vmmov %vm2041_vm4  ;;  %v1474_v18 = vld [vmem:[%s2029_s12] ss:$0 sm:$0xff] }
 0x31e   : > { %727 = vmax.xlane.f32.xlu2 %v726_v38  ;;  %v932_v15 = vmul.f32 0.3, %v931_v39  ;;  %v1023_v23 = vrot.slane %v1022_v2, 1  ;;  %v1035_v39 = vld [vmem:[%s2023_s6] sm:$0x1]  ;;  %vm2047_vm0 = vmmov %vm2041_vm4 }
 0x320   : > { %v933_v40 = vadd.f32 %v932_v15, %v926_v35  ;;  %v1024_v29 = vadd.f32 %v1023_v23, %v1022_v2 }
 0x322   : > { %vm934_vm3 = vcmp.ge.f32.partialorder %v1871_v19, %v933_v40 }
 0x323   : > { %v935_v30 = vsel %vm934_vm3, %v1871_v19, -inf  ;;  %vm1243_vm3 = vcmask 124928  }
 0x324   : > { %v936_v41 = vsel %vm578_vm2, %v935_v30, -inf }
 0x325   : > { %937 = vmax.xlane.f32.xlu1 %v936_v41 }
 0x33e   : > { %632 = vrot.lane.b32.xlu1 %v1841_v5, %s1686_s22 }
 0x346   : > { %947 = vrot.lane.b32.xlu1 %v1841_v5, %s1687_s23 }
 0x382   : > { %v623_v16 = vpop.xlane.xlu1 %622 }
 0x383   : > { %v624_v42 = vsub.f32 %v1938_v8, %v623_v16 }
 0x385   : > { %v625_v43 = vmul.f32 1.442695, %v624_v42 }
 0x387   : > { %1475 = vpow2.f32 %v625_v43 }
 0x38d   : > { %v1476_v44 = vpop.eup %1475 }
 0x38e   : > { %v627_v45 = vsel %vm578_vm2, %v1476_v44, 0.0 }
 0x38f   : > { %v833_v46 = vpop.xlane.xlu0 %832  ;;  %628 = vadd.xlane.f32.xlu2 %v627_v45 }
 0x390   : > { %v834_v19 = vsub.f32 %v830_v31, %v833_v46 }
 0x391   : > { %v728_v47 = vpop.xlane.xlu2 %727 }
 0x392   : > { %v835_v48 = vmul.f32 1.442695, %v834_v19  ;;  %v729_v49 = vsub.f32 %v725_v37, %v728_v47  ;;  %v1078_v37 = vld [vmem:[#allocation7] sm:$0xff] }
 0x393   : > { %1099 = vmatpush.msra.mxu3 %v1078_v37 }
 0x394   : > { %1477 = vpow2.f32 %v835_v48  ;;  %v730_v50 = vmul.f32 1.442695, %v729_v49 }
 0x396   : > { %1479 = vpow2.f32 %v730_v50 }
 0x398   : > { %v938_v51 = vpop.xlane.xlu1 %937 }
 0x399   : > { %v939_v53 = vsub.f32 %v935_v30, %v938_v51 }
 0x39a   : > { %v1478_v52 = vpop.eup %1477 }
 0x39b   : > { %v837_v54 = vsel %vm578_vm2, %v1478_v52, 0.0  ;;  %v940_v56 = vmul.f32 1.442695, %v939_v53  ;;  %v989_v53 = vld [vmem:[#allocation4] sm:$0xff] }
 0x39c   : > { %v1480_v55 = vpop.eup %1479  ;;  %838 = vadd.xlane.f32.xlu2 %v837_v54 }
 0x39d   : > { %v732_v57 = vsel %vm578_vm2, %v1480_v55, 0.0  ;;  %1481 = vpow2.f32 %v940_v56 }
 0x39e   : > { %733 = vadd.xlane.f32.xlu0 %v732_v57 }
 0x3a3   : > { %v1482_v58 = vpop.eup %1481 }
 0x3a4   : > { %v942_v59 = vsel %vm578_vm2, %v1482_v58, 0.0 }
 0x3a6   : > { %943 = vadd.xlane.f32.xlu0 %v942_v59 }
 0x3b0   : > { %v633_v60 = vpop.permute.xlu1 %632 }
 0x3b1   : > { %653 = vmatpush.msra.mxu2 %v633_v60  ;;  %v1111_v60 = vld [vmem:[#allocation9 + $0x8] sm:$0xff] }
 0x3b4   : > { %737 = vrot.lane.b32.xlu2 %v1841_v5, %s1688_s29 }
 0x3b8   : > { %v948_v8 = vpop.permute.xlu1 %947 }
 0x3ba   : > { %842 = vrot.lane.b32.xlu0 %v1841_v5, %s1689_s16  ;;  %s1364_s16 = sshll.u32 %s2049_s26, 2 }
 0x402   : > { %v629_v61 = vpop.xlane.xlu2 %628 }
 0x403   : > { %1483 = vrcp.f32 %v629_v61  ;;  %v1110_v61 = vld [vmem:[#allocation9] sm:$0xff] }
 0x409   : > { %v1484_v62 = vpop.eup %1483 }
 0x40a   : > { %v631_v63 = vmul.f32 %v1484_v62, %v1476_v44  ;;  %v1080_v62 = vld [vmem:[%s2025_s8] sm:$0x1] }
 0x40c   : > { %1370 = vmatmul.msk.f32.vlgmr.msra.gmra.mxu2 %vm578_vm2, %v631_v63 }
 0x40f   : > { %v839_v0 = vpop.xlane.xlu2 %838 }
 0x411   : > { %v734_v1 = vpop.xlane.xlu0 %733 }
 0x412   : > { %1485 = vrcp.f32 %v734_v1 }
 0x413   : > { %1487 = vrcp.f32 %v1690_v3  ;;  %v1472_v3 = vld [vmem:[%s2021_s4] ss:$0 sm:$0xff] }
 0x417   : > { %v738_v6 = vpop.permute.xlu2 %737 }
 0x418   : > { %v1486_v7 = vpop.eup %1485  ;;  %758 = vmatpush.msrb.mxu2 %v738_v6 }
 0x419   : > { %v944_v9 = vpop.xlane.xlu0 %943  ;;  %v736_v5 = vmul.f32 %v1486_v7, %v1480_v55  ;;  %v1488_v11 = vpop.eup %1487 }
 0x41a   : > { %968 = vmatpush.msra.mxu2 %v948_v8  ;;  %1489 = vrcp.f32 %v944_v9  ;;  %v1026_v13 = vmul.f32 8.0, %v1488_v11  ;;  %vm1030_vm5 = vweird.f32 %v1488_v11 }
 0x41b   : > { %1375 = vmatmul.msk.f32.vlgmr.msrb.gmra.mxu2 %vm578_vm2, %v736_v5  ;;  %1491 = vrcp.f32 %v839_v0 }
 0x41c   : > { %v1027_v20 = vsub.f32 1.0, %v1026_v13  ;;  %1133 = vmatpush.msrb.mxu2 %v1111_v60  ;;  %v1473_v13 = vld [vmem:[%s2027_s10] ss:$0 sm:$0xff] }
 0x41e   : > { %v1028_v21 = vmul.f32 %v1488_v11, %v1027_v20  ;;  %1134 = vmatpush.msrb.mxu2 %v1110_v61 }
 0x420   : > { %v1490_v14 = vpop.eup %1489  ;;  %v1029_v24 = vadd.f32 %v1488_v11, %v1028_v21 }
 0x421   : > { %v946_v17 = vmul.f32 %v1490_v14, %v1482_v58  ;;  %v1492_v22 = vpop.eup %1491 }
 0x422   : > { %v841_v27 = vmul.f32 %v1492_v22, %v1478_v52  ;;  %v1031_v31 = vsel %vm1030_vm5, %v1488_v11, %v1029_v24  ;;  %v990_v52 = vld [vmem:[#allocation4 + $0x8] sm:$0xff]  ;;  %v1140_v11 = vld [vmem:[%s2028_s11 + $0x8] sm:$0xff] }
 0x423   : > { %1385 = vmatmul.msk.f32.vlgmr.msra.gmra.mxu2 %vm578_vm2, %v946_v17  ;;  %v1032_v32 = vmul.f32 %v1031_v31, %v1024_v29  ;;  %1012 = vmatpush.msra.mxu0 %v990_v52 }
 0x425   : > { %1013 = vmatpush.msra.mxu0 %v989_v53 }
 0x427   : > { %1162 = vmatpush.msrb.mxu0 %v1140_v11 }
 0x429   : > { %1163 = vmatpush.msrb.mxu0 %v1139_v12 }
 0x42c   : > { %v843_v26 = vpop.permute.xlu0 %842 }
 0x42d   : > { %863 = vmatpush.msrb.mxu1 %v843_v26 }
 0x42e   : > { %1380 = vmatmul.msk.f32.vlgmr.msrb.gmra.mxu1 %vm578_vm2, %v841_v27 }
 0x42f   : > { %1053 = vmatpush.msra.mxu1 %v1034_v28 }
 0x431   : > { %1054 = vmatpush.msra.mxu1 %v1033_v25 }
 0x436   : > { %1387 = vmatmul.msk.f32.vlgmr.msra.gmra.mxu1 %vm2042_vm8, %v1032_v32 }
 0x48f   : > { %v655_v33 = vpop.f32.mrf.mxu2 }
 0x49e   : > { %v760_v34 = vpop.f32.mrf.mxu2 }
 0x49f   : > { %974 = vrot.lane.b32.xlu1 %v760_v34, %s1691_s18 }
 0x4a6   : > { %v970_v35 = vpop.f32.mrf.mxu2 }
 0x4a7   : > { %982 = vrot.lane.b32.xlu2 %v970_v35, %s1692_s1 }
 0x4ab   : > { %v865_v38 = vpop.f32.mrf.mxu1 }
 0x4ac   : > { %978 = vrot.lane.b32.xlu0 %v865_v38, %s1693_s3  ;;  %s518_s3 = scalar_lea.vmem %s2030_s13, %s1364_s16 }
 0x4b3   : > { %v1056_v15 = vpop.f32.mrf.mxu1 }
 0x4b4   : > { %v1057_v40 = vadd.f32 %v1056_v15, %v1035_v39 }
 0x4b6   : > { %v1059_v30 = vsub.f32 0.0, %v1057_v40 }
 0x4b8   : > { %v1060_v41 = vmul.f32 1.442695, %v1059_v30 }
 0x4ba   : > { %1493 = vpow2.f32 %v1060_v41 }
 0x4c0   : > { %v1494_v16 = vpop.eup %1493 }
 0x4c1   : > { %v1062_v42 = vadd.f32 1.0, %v1494_v16 }
 0x4c3   : > { %1495 = vrcp.f32 %v1062_v42  ;;  %v1074_v45 = vand.u32 2147483648, %v1062_v42  ;;  %vm1068_vm11 = vweird.f32 %v1062_v42  ;;  %v1072_v19 = vand.u32 2147483647, %v1062_v42 }
 0x4c5   : > { %v1075_v48 = vor.u32 1.1754944e-38, %v1074_v45  ;;  %vm1073_vm10 = vcmp.eq.f32.partialorder %v1072_v19, 8.507059e+37 }
 0x4c9   : > { %v1496_v43 = vpop.eup %1495 }
 0x4ca   : > { %v1064_v44 = vmul.f32 %v1496_v43, %v1062_v42  ;;  %vm1069_vm7 = vweird.f32 %v1496_v43 }
 0x4cb   : > { %vm1070_vm1 = vmor %vm1068_vm11, %vm1069_vm7 }
 0x4cc   : > { %v1065_v46 = vsub.f32 1.0, %v1064_v44 }
 0x4ce   : > { %v1066_v47 = vmul.f32 %v1496_v43, %v1065_v46 }
 0x4d0   : > { %v1067_v49 = vadd.f32 %v1496_v43, %v1066_v47 }
 0x4d2   : > { %v1071_v50 = vsel %vm1070_vm1, %v1496_v43, %v1067_v49 }
 0x4d3   : > { %v1076_v51 = vsel %vm1073_vm10, %v1075_v48, %v1071_v50 }
 0x4d4   : > { %1388 = vmatmul.msk.f32.vlgmr.msra.gmra.mxu3 %vm2043_vm6, %v1076_v51 }
 0x501   : > { %v983_v57 = vpop.permute.xlu2 %982 }
 0x511   : > { %v975_v54 = vpop.permute.xlu1 %974 }
 0x512   : > { %v985_v55 = vsel %vm2044_vm9, %v655_v33, %v975_v54 }
 0x51e   : > { %v979_v56 = vpop.permute.xlu0 %978 }
 0x51f   : > { %v986_v58 = vsel %vm578_vm2, %v985_v55, %v979_v56 }
 0x520   : > { %v988_v59 = vsel %vm987_vm12, %v986_v58, %v983_v57 }
 0x521   : > { %1386 = vmatmul.msk.f32.vlgmr.msra.gmra.mxu0 %vm2045_vm13, %v988_v59 }
 0x557   : > { %v1101_v63 = vpop.f32.mrf.mxu3 }
 0x558   : > { %v1102_v0 = vadd.f32 %v1101_v63, %v1080_v62 }
 0x55a   : > { %v1106_v1 = vsub.f32 1.0, %v1102_v0  ;;  %v1104_v7 = vperm.slane %v1102_v0, 0 }
 0x55c   : > { %v1107_v4 = vperm.slane %v1106_v1, 0 }
 0x55e   : > { %v1108_v9 = vmul.f32 %v1107_v4, %v988_v59 }
 0x59e   : > { %v1015_v6 = vpop.f32.mrf.mxu0 }
 0x59f   : > { %v1016_v8 = vadd.f32 %v1472_v3, %v1015_v6 }
 0x5a1   : > { %v1105_v5 = vmul.f32 %v1104_v7, %v1016_v8 }
 0x5a3   : > { %v1109_v10 = vadd.f32 %v1108_v9, %v1105_v5 }
 0x5a5   : > { %1389 = vmatmul.msk.f32.vlgmr.msrb.gmra.mxu2 %vm2046_vm14, %v1109_v10 }
 0x628   : > { %v1136_v14 = vpop.f32.mrf.mxu2 }
 0x629   : > { %v1137_v17 = vadd.f32 %v1473_v13, %v1136_v14 }
 0x62b   : > { %1390 = vmatmul.msk.f32.vlgmr.msrb.gmra.mxu0 %vm2047_vm0, %v1137_v17  ;;  %1238 = vmatpush.msrb.mxu1 %v1137_v17 }
 0x6a8   : > { %v1165_v20 = vpop.f32.mrf.mxu0 }
 0x6a9   : > { %v1166_v2 = vadd.f32 %v1474_v18, %v1165_v20 }
 0x6ab   : > { %v1169_v21 = vsel %vm1168_vm15, %v1166_v2, -inf }
 0x6ac   : > { %v1170_v22 = vrot.slane %v1169_v21, 4 }
 0x6ae   : > { %v1171_v23 = vmax.f32 %v1169_v21, %v1170_v22 }
 0x6b0   : > { %v1172_v24 = vrot.slane %v1171_v23, 2 }
 0x6b2   : > { %v1173_v26 = vmax.f32 %v1171_v23, %v1172_v24 }
 0x6b4   : > { %v1174_v27 = vrot.slane %v1173_v26, 1 }
 0x6b6   : > { %v1175_v28 = vmax.f32 %v1173_v26, %v1174_v27 }
 0x6b8   : > { %v1176_v29 = vsub.f32 %v1166_v2, %v1175_v28 }
 0x6ba   : > { %v1177_v25 = vmul.f32 1.442695, %v1176_v29 }
 0x6bc   : > { %1497 = vpow2.f32 %v1177_v25 }
 0x6c2   : > { %v1498_v31 = vpop.eup %1497 }
 0x6c3   : > { %v1179_v32 = vsel %vm1168_vm15, %v1498_v31, 0.0 }
 0x6c4   : > { %v1180_v33 = vrot.slane %v1179_v32, 4 }
 0x6c6   : > { %v1181_v34 = vadd.f32 %v1180_v33, %v1179_v32 }
 0x6c8   : > { %v1182_v35 = vrot.slane %v1181_v34, 2 }
 0x6ca   : > { %v1183_v36 = vadd.f32 %v1182_v35, %v1181_v34 }
 0x6cc   : > { %v1184_v37 = vrot.slane %v1183_v36, 1 }
 0x6ce   : > { %v1185_v38 = vadd.f32 %v1184_v37, %v1183_v36 }
 0x6d0   : > { %1499 = vrcp.f32 %v1185_v38 }
 0x6d6   : > { %v1500_v39 = vpop.eup %1499 }
 0x6d7   : > { %v1187_v15 = vmul.f32 %v1500_v39, %v1498_v31 }
 0x6d9   : > { %1188 = vxpose.xlu1.b32.start.end [1/1] (short) (narrow) %v1187_v15, 8 }
 0x77d   : > { %v1204_v40 = vpop.trf.xlu1 }
 0x77e   : > { %1391 = vmatmul.msk.f32.vlgmr.msrb.gmra.mxu1 %vm578_vm2, %v1204_v40 }
 0x7fb   : > { %v1240_v30 = vpop.f32.mrf.mxu1 }
 0x7fc   : > { %1244 = vst.msk [vmem:[%s518_s3] sm:$0x7] %vm1243_vm3, %v1240_v30 }
 0x7fd PF: > { %s26_s25 = sadd.s32 1, %s1669_s25  }
 0x7fe   : > { %p23_p7 = scmp.ge.s32.totalorder %s26_s25, 4  }
 0x800   :  { %25 = sbr.rel (!%p23_p7) target bundleno = 7 (0x7), region = 123 }
 0x805   :  { %1264 = vsyncpa [#allocation3], 1 }
 0x806   :  { %1266 = vsyncpa [#allocation3 + $0x1], 1 }
 0x807   :  { %1267 = vsyncpa [#allocation5], 1 }
 0x808   :  { %1268 = vsyncpa [#allocation8], 1 }

</bundles_post_ra>
